<compile_context>
chip_gen: v7x
topology: tpu7x:2x2x1
jax: 0.10.0
libtpu: 0.0.40
codegen_flags: <defaults>
</compile_context>

<pallas_src>
import math
import numpy as np
import jax
import jax.numpy as jnp
from jax.experimental import pallas as pl
from jax.experimental.pallas import tpu as pltpu

# ----------------------------------------------------------------------------
# Small config (scaled-down TrainingConfig)
# ----------------------------------------------------------------------------
VOCAB = 128          # vocab_size
D = 32               # model_dim
H = 4                # num_heads
HD = D // H          # head_dim
NS = 8               # num_splats_per_head
LAYERS = 2           # num_layers
MAX_SEQ = 32         # max_seq_len
WINDOW = 8           # trajectory_window
TRAJ_STRENGTH = 0.2  # trajectory_strength
LN_EPS = 1e-5
_INV_SQRT2 = 1.0 / math.sqrt(2.0)

BATCH = 2
SEQ = 16


# ----------------------------------------------------------------------------
# In-kernel helpers
# ----------------------------------------------------------------------------
def _dot(a, b):
    return jnp.dot(a, b, preferred_element_type=jnp.float32)


def _dot_nt(a, b):
    # a: [m, k], b: [n, k] -> [m, n]  (contract last dims; no transpose copy)
    return jax.lax.dot_general(a, b, (((1,), (1,)), ((), ())),
                               preferred_element_type=jnp.float32)


def _layernorm(x, w, b):
    mu = jnp.mean(x, axis=-1, keepdims=True)
    xc = x - mu
    var = jnp.mean(xc * xc, axis=-1, keepdims=True)
    return xc * jax.lax.rsqrt(var + LN_EPS) * w + b


# ----------------------------------------------------------------------------
# Single fused kernel: embeddings in -> logits out (all layers + head)
# ----------------------------------------------------------------------------
def _lm_fused_kernel(x_ref, shift_ref, m_ref, onebd_ref, maskk_ref, maskv_ref,
                     segones_ref, wqkv_ref, wout_ref, cbd_ref, csq_ref,
                     amps_ref, invden_ref, gates_ref, ln1w_ref, ln1b_ref,
                     w1_ref, b1_ref, w2_ref, b2_ref, ln2w_ref, ln2b_ref,
                     lnfw_ref, lnfb_ref, whead_ref, o_ref):
    x = x_ref[0]                      # [S, D]   current activations (resident)
    shift = shift_ref[...]            # [S, S]   shift[i, i-1] = 1 (row 0 zero)
    Mp = m_ref[...]                   # [S, S]   padded window/distance weights
    one_bd = onebd_ref[...]           # [D, H*NS]  kron(I_H, ones(HD, NS))
    mask_k = maskk_ref[...]           # [H*S, H*NS] kron(I_H, ones(S, NS))
    mask_v = maskv_ref[...]           # [H*S, D]    kron(I_H, ones(S, HD))
    seg_ones = segones_ref[...]       # [H*S, H*S]  kron(I_H, ones(S, S))
    gates = gates_ref[...]            # [L, 1]      sigmoid(trajectory_gate)

    for l in range(LAYERS):           # static unroll (LAYERS = 2)
        # ---- trajectory flows (compute_batch_trajectories), all [S, *] shapes.
        # dx[j] = x[j] - x[j-1] for j >= 1; row 0 contributes nothing because
        # column 0 of Mp is all-zero.
        dx = x - _dot(shift, x)                              # [S, D]
        mag = jnp.sqrt(jnp.sum(dx * dx, axis=-1, keepdims=True))
        ntraj = dx / jnp.maximum(mag, 1e-8)                  # normalized traj
        magw = jnp.tanh(mag)                                 # magnitude weights
        wsum = jnp.maximum(_dot(Mp, magw), 1e-8)             # [S, 1]
        flows = _dot(Mp, magw * ntraj) / wsum                # [S, D]

        # ---- qkv projection + trajectory enhancement
        qkv = _dot(x, wqkv_ref[l])                           # [S, 3D]
        q = qkv[:, :D]
        k = qkv[:, D:2 * D]
        v = qkv[:, 2 * D:]
        gflow = gates[l:l + 1, :] * flows                    # sigmoid(gate)*flows
        qe = q + gflow
        ke = k + gflow

        # ---- head-batched splat weights: [S, H*NS] in one shot
        csq = csq_ref[l]                                     # [1, H*NS]
        amps = amps_ref[l]                                   # [1, H*NS]
        invden = invden_ref[l]                               # [1, H*NS]
        cbd = cbd_ref[l]                                     # [D, H*NS] blk-diag centers
        q_d = _dot(qe * qe, one_bd) + csq - 2.0 * _dot(qe, cbd)
        k_d = _dot(ke * ke, one_bd) + csq - 2.0 * _dot(ke, cbd)
        q_w = amps * jnp.exp(-0.5 * q_d * invden)            # [S, H*NS]
        k_w = amps * jnp.exp(-0.5 * k_d * invden)            # [S, H*NS]

        # ---- per-head scores/softmax/PV flattened to [S, H*S] (no head loop)
        # scores[i, h*S+j] = sum_n q_w[i, h*NS+n] * k_w[j, h*NS+n]
        k_bd = jnp.concatenate([k_w] * H, axis=0) * mask_k   # [H*S, H*NS]
        scores = _dot_nt(q_w, k_bd)                          # [S, H*S]
        rmax = jnp.max(scores, axis=-1, keepdims=True)       # shift-invariant per block
        e = jnp.exp(scores - rmax)
        probs = e / _dot(e, seg_ones)                        # per-head softmax
        v_bd = jnp.concatenate([v] * H, axis=0) * mask_v     # [H*S, D]
        attn = _dot(_dot(probs, v_bd), wout_ref[l])          # concat-heads @ out_proj

        # ---- residual + LN + FFN(GELU) + residual + LN  (dropout = identity)
        h1 = _layernorm(x + attn, ln1w_ref[l], ln1b_ref[l])
        f = _dot(h1, w1_ref[l]) + b1_ref[l]
        f = 0.5 * f * (1.0 + jax.lax.erf(f * _INV_SQRT2))    # exact (erf) GELU
        f = _dot(f, w2_ref[l]) + b2_ref[l]
        x = _layernorm(h1 + f, ln2w_ref[l], ln2b_ref[l])

    # ---- final LayerNorm + LM head (lane-dense [S, 128] store)
    hfin = _layernorm(x, lnfw_ref[...], lnfb_ref[...])
    o_ref[0] = _dot(hfin, whead_ref[...])


# ----------------------------------------------------------------------------
# pallas_call wrapper (single launch per forward)
# ----------------------------------------------------------------------------
def _rep_spec(a):
    """Full-array BlockSpec that ignores the batch grid index (loaded once)."""
    rank = a.ndim
    shape = tuple(a.shape)
    return pl.BlockSpec(shape, lambda b, _r=rank: (0,) * _r)


def language_model_forward(params, input_ids, consts):
    B_, S_ = input_ids.shape

    # Embedding lookup (tiny XLA gather) -> [B, S, D]
    x = params["tok_emb"][input_ids] + params["pos_emb"][:S_][None, :, :]

    # ---- hoisted, layer/batch-invariant parameter transforms (tiny XLA ops)
    centers = params["centers"]                               # [L, H, NS, HD]
    cbd = jnp.einsum("hg,lgnd->lhdgn", jnp.eye(H, dtype=jnp.float32), centers)
    cbd = cbd.reshape(LAYERS, D, H * NS)                      # block-diag centers
    csq = jnp.sum(centers * centers, axis=-1).reshape(LAYERS, 1, H * NS)
    amps = jax.nn.sigmoid(params["amps"]).reshape(LAYERS, 1, H * NS)
    invden = (1.0 / (jnp.exp(params["lscales"]) ** 2 + 1e-8)).reshape(
        LAYERS, 1, H * NS)
    gates = jax.nn.sigmoid(params["gate"])                    # [L, 1]

    args = (x, consts["shift"], consts["M"], consts["one_bd"], consts["mask_k"],
            consts["mask_v"], consts["seg_ones"],
            params["wqkv"], params["wout"], cbd, csq, amps, invden, gates,
            params["ln1w"], params["ln1b"], params["w1"], params["b1"],
            params["w2"], params["b2"], params["ln2w"], params["ln2b"],
            params["lnfw"], params["lnfb"], params["whead"])

    in_specs = [pl.BlockSpec((1, S_, D), lambda b: (b, 0, 0))] + \
               [_rep_spec(a) for a in args[1:]]

    return pl.pallas_call(
        _lm_fused_kernel,
        out_shape=jax.ShapeDtypeStruct((B_, S_, VOCAB), jnp.float32),
        grid=(B_,),
        in_specs=in_specs,
        out_specs=pl.BlockSpec((1, S_, VOCAB), lambda b: (b, 0, 0)),
        compiler_params=pltpu.CompilerParams(
            dimension_semantics=("parallel",)),   # keeps both v7x TCs busy
    )(*args)


# ----------------------------------------------------------------------------
# Static (data-independent) constant matrices
# ----------------------------------------------------------------------------
def build_constants(S_):
    # Padded trajectory weight matrix: column j holds the distance weight of
    # trajectory (x[j] - x[j-1]); column 0 is zero.
    M = np.zeros((S_, S_), dtype=np.float32)
    for pos in range(1, S_):
        ws = max(0, pos - WINDOW)
        we = min(pos, S_ - 1)
        for t in range(ws, we):
            M[pos, t + 1] = 1.0 / (1.0 + abs(float(t) - pos + 1.0))
    # Shift matrix: (shift @ x)[i] = x[i-1] for i >= 1, 0 for i = 0.
    shift = np.zeros((S_, S_), dtype=np.float32)
    for i in range(1, S_):
        shift[i, i - 1] = 1.0
    eye_h = np.eye(H, dtype=np.float32)
    consts = {
        "M": M,
        "shift": shift,
        "one_bd": np.kron(eye_h, np.ones((HD, NS), np.float32)),   # [D, H*NS]
        "mask_k": np.kron(eye_h, np.ones((S_, NS), np.float32)),   # [H*S, H*NS]
        "mask_v": np.kron(eye_h, np.ones((S_, HD), np.float32)),   # [H*S, D]
        "seg_ones": np.kron(eye_h, np.ones((S_, S_), np.float32)), # [H*S, H*S]
    }
    return {k: jnp.asarray(v) for k, v in consts.items()}


# ----------------------------------------------------------------------------
# Deterministic parameter init (mirrors LanguageModel._init_weights),
# stacked along a leading [LAYERS] axis.
# ----------------------------------------------------------------------------
def init_params(key):
    keys = iter(jax.random.split(key, 16))
    n = lambda shape: (0.02 * jax.random.normal(next(keys), shape)).astype(jnp.float32)
    return {
        "tok_emb": n((VOCAB, D)),
        "pos_emb": n((MAX_SEQ, D)),
        "wqkv": n((LAYERS, D, 3 * D)),                         # qkv_proj.weight.T
        "wout": n((LAYERS, D, D)),                             # out_proj.weight.T
        "centers": n((LAYERS, H, NS, HD)),                     # splat_centers
        "lscales": jnp.zeros((LAYERS, H, NS), jnp.float32),    # splat_log_scales
        "amps": jnp.ones((LAYERS, H, NS), jnp.float32),        # splat_amplitudes
        "gate": jnp.full((LAYERS, 1), TRAJ_STRENGTH, jnp.float32),
        "ln1w": jnp.ones((LAYERS, 1, D), jnp.float32),
        "ln1b": jnp.zeros((LAYERS, 1, D), jnp.float32),
        "w1": n((LAYERS, D, 4 * D)), "b1": jnp.zeros((LAYERS, 1, 4 * D), jnp.float32),
        "w2": n((LAYERS, 4 * D, D)), "b2": jnp.zeros((LAYERS, 1, D), jnp.float32),
        "ln2w": jnp.ones((LAYERS, 1, D), jnp.float32),
        "ln2b": jnp.zeros((LAYERS, 1, D), jnp.float32),
        "lnfw": jnp.ones((1, D), jnp.float32),
        "lnfb": jnp.zeros((1, D), jnp.float32),
        "whead": n((D, VOCAB)),                                # lm_head.weight.T
    }


if __name__ == "__main__":
    key = jax.random.PRNGKey(0)
    pkey, dkey = jax.random.split(key)
    params = init_params(pkey)
    consts = build_constants(SEQ)
    input_ids = jax.random.randint(dkey, (BATCH, SEQ), 0, VOCAB)

    fwd = jax.jit(language_model_forward)
    logits = jax.block_until_ready(fwd(params, input_ids, consts))

    assert logits.shape == (BATCH, SEQ, VOCAB), logits.shape
    assert bool(jnp.isfinite(logits).all())
    print("KERNEL_OK")
</pallas_src>

<mosaic_0001>
module attributes {stable_mosaic.version = 11 : i64} {
  func.func @_lm_fused_kernel(%arg0: i32, %arg1: memref<1x16x32xf32, #tpu.memory_space<vmem>>, %arg2: memref<16x16xf32, #tpu.memory_space<vmem>>, %arg3: memref<16x16xf32, #tpu.memory_space<vmem>>, %arg4: memref<32x32xf32, #tpu.memory_space<vmem>>, %arg5: memref<64x32xf32, #tpu.memory_space<vmem>>, %arg6: memref<64x32xf32, #tpu.memory_space<vmem>>, %arg7: memref<64x64xf32, #tpu.memory_space<vmem>>, %arg8: memref<2x32x96xf32, #tpu.memory_space<vmem>>, %arg9: memref<2x32x32xf32, #tpu.memory_space<vmem>>, %arg10: memref<2x32x32xf32, #tpu.memory_space<vmem>>, %arg11: memref<2x1x32xf32, #tpu.memory_space<vmem>>, %arg12: memref<2x1x32xf32, #tpu.memory_space<vmem>>, %arg13: memref<2x1x32xf32, #tpu.memory_space<vmem>>, %arg14: memref<2x1xf32, #tpu.memory_space<vmem>>, %arg15: memref<2x1x32xf32, #tpu.memory_space<vmem>>, %arg16: memref<2x1x32xf32, #tpu.memory_space<vmem>>, %arg17: memref<2x32x128xf32, #tpu.memory_space<vmem>>, %arg18: memref<2x1x128xf32, #tpu.memory_space<vmem>>, %arg19: memref<2x128x32xf32, #tpu.memory_space<vmem>>, %arg20: memref<2x1x32xf32, #tpu.memory_space<vmem>>, %arg21: memref<2x1x32xf32, #tpu.memory_space<vmem>>, %arg22: memref<2x1x32xf32, #tpu.memory_space<vmem>>, %arg23: memref<1x32xf32, #tpu.memory_space<vmem>>, %arg24: memref<1x32xf32, #tpu.memory_space<vmem>>, %arg25: memref<32x128xf32, #tpu.memory_space<vmem>>, %arg26: memref<1x16x128xf32, #tpu.memory_space<vmem>>) attributes {dimension_semantics = [#tpu.dimension_semantics<parallel>], iteration_bounds = array<i64: 2>, scalar_prefetch = 0 : i64, scratch_operands = 0 : i64, tpu.core_type = #tpu.core_type<tc>, window_params = [{transform_indices = @transform_0, window_bounds = array<i64: 1, 16, 32>}, {pipeline_mode = #tpu.pipeline_mode<synchronous>, transform_indices = @transform_1, window_bounds = array<i64: 16, 16>}, {pipeline_mode = #tpu.pipeline_mode<synchronous>, transform_indices = @transform_2, window_bounds = array<i64: 16, 16>}, {pipeline_mode = #tpu.pipeline_mode<synchronous>, transform_indices = @transform_3, window_bounds = array<i64: 32, 32>}, {pipeline_mode = #tpu.pipeline_mode<synchronous>, transform_indices = @transform_4, window_bounds = array<i64: 64, 32>}, {pipeline_mode = #tpu.pipeline_mode<synchronous>, transform_indices = @transform_5, window_bounds = array<i64: 64, 32>}, {pipeline_mode = #tpu.pipeline_mode<synchronous>, transform_indices = @transform_6, window_bounds = array<i64: 64, 64>}, {pipeline_mode = #tpu.pipeline_mode<synchronous>, transform_indices = @transform_7, window_bounds = array<i64: 2, 32, 96>}, {pipeline_mode = #tpu.pipeline_mode<synchronous>, transform_indices = @transform_8, window_bounds = array<i64: 2, 32, 32>}, {pipeline_mode = #tpu.pipeline_mode<synchronous>, transform_indices = @transform_9, window_bounds = array<i64: 2, 32, 32>}, {pipeline_mode = #tpu.pipeline_mode<synchronous>, transform_indices = @transform_10, window_bounds = array<i64: 2, 1, 32>}, {pipeline_mode = #tpu.pipeline_mode<synchronous>, transform_indices = @transform_11, window_bounds = array<i64: 2, 1, 32>}, {pipeline_mode = #tpu.pipeline_mode<synchronous>, transform_indices = @transform_12, window_bounds = array<i64: 2, 1, 32>}, {pipeline_mode = #tpu.pipeline_mode<synchronous>, transform_indices = @transform_13, window_bounds = array<i64: 2, 1>}, {pipeline_mode = #tpu.pipeline_mode<synchronous>, transform_indices = @transform_14, window_bounds = array<i64: 2, 1, 32>}, {pipeline_mode = #tpu.pipeline_mode<synchronous>, transform_indices = @transform_15, window_bounds = array<i64: 2, 1, 32>}, {pipeline_mode = #tpu.pipeline_mode<synchronous>, transform_indices = @transform_16, window_bounds = array<i64: 2, 32, 128>}, {pipeline_mode = #tpu.pipeline_mode<synchronous>, transform_indices = @transform_17, window_bounds = array<i64: 2, 1, 128>}, {pipeline_mode = #tpu.pipeline_mode<synchronous>, transform_indices = @transform_18, window_bounds = array<i64: 2, 128, 32>}, {pipeline_mode = #tpu.pipeline_mode<synchronous>, transform_indices = @transform_19, window_bounds = array<i64: 2, 1, 32>}, {pipeline_mode = #tpu.pipeline_mode<synchronous>, transform_indices = @transform_20, window_bounds = array<i64: 2, 1, 32>}, {pipeline_mode = #tpu.pipeline_mode<synchronous>, transform_indices = @transform_21, window_bounds = array<i64: 2, 1, 32>}, {pipeline_mode = #tpu.pipeline_mode<synchronous>, transform_indices = @transform_22, window_bounds = array<i64: 1, 32>}, {pipeline_mode = #tpu.pipeline_mode<synchronous>, transform_indices = @transform_23, window_bounds = array<i64: 1, 32>}, {pipeline_mode = #tpu.pipeline_mode<synchronous>, transform_indices = @transform_24, window_bounds = array<i64: 32, 128>}, {transform_indices = @transform_25, window_bounds = array<i64: 1, 16, 128>}]} {
    %c0 = arith.constant 0 : index
    %c0_0 = arith.constant 0 : index
    %c0_1 = arith.constant 0 : index
    %0 = vector.load %arg1[%c0, %c0_0, %c0_1] : memref<1x16x32xf32, #tpu.memory_space<vmem>>, vector<1x16x32xf32>
    %1 = vector.shape_cast %0 : vector<1x16x32xf32> to vector<16x32xf32>
    %c0_2 = arith.constant 0 : index
    %c0_3 = arith.constant 0 : index
    %2 = vector.load %arg2[%c0_2, %c0_3] : memref<16x16xf32, #tpu.memory_space<vmem>>, vector<16x16xf32>
    %c0_4 = arith.constant 0 : index
    %c0_5 = arith.constant 0 : index
    %3 = vector.load %arg3[%c0_4, %c0_5] : memref<16x16xf32, #tpu.memory_space<vmem>>, vector<16x16xf32>
    %c0_6 = arith.constant 0 : index
    %c0_7 = arith.constant 0 : index
    %4 = vector.load %arg4[%c0_6, %c0_7] : memref<32x32xf32, #tpu.memory_space<vmem>>, vector<32x32xf32>
    %c0_8 = arith.constant 0 : index
    %c0_9 = arith.constant 0 : index
    %5 = vector.load %arg5[%c0_8, %c0_9] : memref<64x32xf32, #tpu.memory_space<vmem>>, vector<64x32xf32>
    %c0_10 = arith.constant 0 : index
    %c0_11 = arith.constant 0 : index
    %6 = vector.load %arg6[%c0_10, %c0_11] : memref<64x32xf32, #tpu.memory_space<vmem>>, vector<64x32xf32>
    %c0_12 = arith.constant 0 : index
    %c0_13 = arith.constant 0 : index
    %7 = vector.load %arg7[%c0_12, %c0_13] : memref<64x64xf32, #tpu.memory_space<vmem>>, vector<64x64xf32>
    %c0_14 = arith.constant 0 : index
    %c0_15 = arith.constant 0 : index
    %8 = vector.load %arg14[%c0_14, %c0_15] : memref<2x1xf32, #tpu.memory_space<vmem>>, vector<2x1xf32>
    %cst = arith.constant dense<0.000000e+00> : vector<16x32xf32>
    %9 = tpu.matmul %2, %1, %cst {dimension_numbers = #tpu.dot_dimension_numbers<[1], [0], [0], [1], [0, 0, 1, 1], [], []>} : vector<16x16xf32>, vector<16x32xf32>, vector<16x32xf32> -> vector<16x32xf32>
    %10 = arith.subf %1, %9 : vector<16x32xf32>
    %11 = arith.mulf %10, %10 : vector<16x32xf32>
    %cst_16 = arith.constant dense<0.000000e+00> : vector<16xf32>
    %12 = vector.multi_reduction <add>, %11, %cst_16 [1] : vector<16x32xf32> to vector<16xf32>
    %13 = vector.shape_cast %12 : vector<16xf32> to vector<16x1xf32>
    %14 = math.sqrt %13 : vector<16x1xf32>
    %cst_17 = arith.constant 9.99999993E-9 : f32
    %15 = vector.broadcast %cst_17 : f32 to vector<16x1xf32>
    %16 = arith.maximumf %14, %15 : vector<16x1xf32>
    %17 = vector.broadcast %16 : vector<16x1xf32> to vector<16x32xf32>
    %18 = arith.divf %10, %17 : vector<16x32xf32>
    %19 = math.tanh %14 : vector<16x1xf32>
    %cst_18 = arith.constant dense<0.000000e+00> : vector<16x1xf32>
    %20 = tpu.matmul %3, %19, %cst_18 {dimension_numbers = #tpu.dot_dimension_numbers<[1], [0], [0], [1], [0, 0, 1, 1], [], []>} : vector<16x16xf32>, vector<16x1xf32>, vector<16x1xf32> -> vector<16x1xf32>
    %cst_19 = arith.constant 9.99999993E-9 : f32
    %21 = vector.broadcast %cst_19 : f32 to vector<16x1xf32>
    %22 = arith.maximumf %20, %21 : vector<16x1xf32>
    %23 = vector.broadcast %19 : vector<16x1xf32> to vector<16x32xf32>
    %24 = arith.mulf %23, %18 : vector<16x32xf32>
    %cst_20 = arith.constant dense<0.000000e+00> : vector<16x32xf32>
    %25 = tpu.matmul %3, %24, %cst_20 {dimension_numbers = #tpu.dot_dimension_numbers<[1], [0], [0], [1], [0, 0, 1, 1], [], []>} : vector<16x16xf32>, vector<16x32xf32>, vector<16x32xf32> -> vector<16x32xf32>
    %26 = vector.broadcast %22 : vector<16x1xf32> to vector<16x32xf32>
    %27 = arith.divf %25, %26 : vector<16x32xf32>
    %c0_21 = arith.constant 0 : index
    %c0_22 = arith.constant 0 : index
    %c0_23 = arith.constant 0 : index
    %28 = vector.load %arg8[%c0_21, %c0_22, %c0_23] : memref<2x32x96xf32, #tpu.memory_space<vmem>>, vector<1x32x96xf32>
    %29 = vector.shape_cast %28 : vector<1x32x96xf32> to vector<32x96xf32>
    %cst_24 = arith.constant dense<0.000000e+00> : vector<16x96xf32>
    %30 = tpu.matmul %1, %29, %cst_24 {dimension_numbers = #tpu.dot_dimension_numbers<[1], [0], [0], [1], [0, 0, 1, 1], [], []>} : vector<16x32xf32>, vector<32x96xf32>, vector<16x96xf32> -> vector<16x96xf32>
    %31 = vector.extract_strided_slice %30 {offsets = [0, 0], sizes = [16, 32], strides = [1, 1]} : vector<16x96xf32> to vector<16x32xf32>
    %32 = vector.extract_strided_slice %30 {offsets = [0, 32], sizes = [16, 32], strides = [1, 1]} : vector<16x96xf32> to vector<16x32xf32>
    %33 = vector.extract_strided_slice %30 {offsets = [0, 64], sizes = [16, 32], strides = [1, 1]} : vector<16x96xf32> to vector<16x32xf32>
    %34 = vector.extract_strided_slice %8 {offsets = [0, 0], sizes = [1, 1], strides = [1, 1]} : vector<2x1xf32> to vector<1x1xf32>
    %35 = vector.broadcast %34 : vector<1x1xf32> to vector<16x32xf32>
    %36 = arith.mulf %35, %27 : vector<16x32xf32>
    %37 = arith.addf %31, %36 : vector<16x32xf32>
    %38 = arith.addf %32, %36 : vector<16x32xf32>
    %c0_25 = arith.constant 0 : index
    %c0_26 = arith.constant 0 : index
    %c0_27 = arith.constant 0 : index
    %39 = vector.load %arg11[%c0_25, %c0_26, %c0_27] : memref<2x1x32xf32, #tpu.memory_space<vmem>>, vector<1x1x32xf32>
    %40 = vector.shape_cast %39 : vector<1x1x32xf32> to vector<1x32xf32>
    %c0_28 = arith.constant 0 : index
    %c0_29 = arith.constant 0 : index
    %c0_30 = arith.constant 0 : index
    %41 = vector.load %arg12[%c0_28, %c0_29, %c0_30] : memref<2x1x32xf32, #tpu.memory_space<vmem>>, vector<1x1x32xf32>
    %42 = vector.shape_cast %41 : vector<1x1x32xf32> to vector<1x32xf32>
    %c0_31 = arith.constant 0 : index
    %c0_32 = arith.constant 0 : index
    %c0_33 = arith.constant 0 : index
    %43 = vector.load %arg13[%c0_31, %c0_32, %c0_33] : memref<2x1x32xf32, #tpu.memory_space<vmem>>, vector<1x1x32xf32>
    %44 = vector.shape_cast %43 : vector<1x1x32xf32> to vector<1x32xf32>
    %c0_34 = arith.constant 0 : index
    %c0_35 = arith.constant 0 : index
    %c0_36 = arith.constant 0 : index
    %45 = vector.load %arg10[%c0_34, %c0_35, %c0_36] : memref<2x32x32xf32, #tpu.memory_space<vmem>>, vector<1x32x32xf32>
    %46 = vector.shape_cast %45 : vector<1x32x32xf32> to vector<32x32xf32>
    %47 = arith.mulf %37, %37 : vector<16x32xf32>
    %cst_37 = arith.constant dense<0.000000e+00> : vector<16x32xf32>
    %48 = tpu.matmul %47, %4, %cst_37 {dimension_numbers = #tpu.dot_dimension_numbers<[1], [0], [0], [1], [0, 0, 1, 1], [], []>} : vector<16x32xf32>, vector<32x32xf32>, vector<16x32xf32> -> vector<16x32xf32>
    %49 = vector.broadcast %40 : vector<1x32xf32> to vector<16x32xf32>
    %50 = arith.addf %48, %49 : vector<16x32xf32>
    %cst_38 = arith.constant dense<0.000000e+00> : vector<16x32xf32>
    %51 = tpu.matmul %37, %46, %cst_38 {dimension_numbers = #tpu.dot_dimension_numbers<[1], [0], [0], [1], [0, 0, 1, 1], [], []>} : vector<16x32xf32>, vector<32x32xf32>, vector<16x32xf32> -> vector<16x32xf32>
    %cst_39 = arith.constant 2.000000e+00 : f32
    %52 = vector.broadcast %cst_39 : f32 to vector<16x32xf32>
    %53 = arith.mulf %52, %51 : vector<16x32xf32>
    %54 = arith.subf %50, %53 : vector<16x32xf32>
    %55 = arith.mulf %38, %38 : vector<16x32xf32>
    %cst_40 = arith.constant dense<0.000000e+00> : vector<16x32xf32>
    %56 = tpu.matmul %55, %4, %cst_40 {dimension_numbers = #tpu.dot_dimension_numbers<[1], [0], [0], [1], [0, 0, 1, 1], [], []>} : vector<16x32xf32>, vector<32x32xf32>, vector<16x32xf32> -> vector<16x32xf32>
    %57 = vector.broadcast %40 : vector<1x32xf32> to vector<16x32xf32>
    %58 = arith.addf %56, %57 : vector<16x32xf32>
    %cst_41 = arith.constant dense<0.000000e+00> : vector<16x32xf32>
    %59 = tpu.matmul %38, %46, %cst_41 {dimension_numbers = #tpu.dot_dimension_numbers<[1], [0], [0], [1], [0, 0, 1, 1], [], []>} : vector<16x32xf32>, vector<32x32xf32>, vector<16x32xf32> -> vector<16x32xf32>
    %cst_42 = arith.constant 2.000000e+00 : f32
    %60 = vector.broadcast %cst_42 : f32 to vector<16x32xf32>
    %61 = arith.mulf %60, %59 : vector<16x32xf32>
    %62 = arith.subf %58, %61 : vector<16x32xf32>
    %cst_43 = arith.constant -5.000000e-01 : f32
    %63 = vector.broadcast %cst_43 : f32 to vector<16x32xf32>
    %64 = arith.mulf %63, %54 : vector<16x32xf32>
    %65 = vector.broadcast %44 : vector<1x32xf32> to vector<16x32xf32>
    %66 = arith.mulf %64, %65 : vector<16x32xf32>
    %67 = math.exp %66 : vector<16x32xf32>
    %68 = vector.broadcast %42 : vector<1x32xf32> to vector<16x32xf32>
    %69 = arith.mulf %68, %67 : vector<16x32xf32>
    %cst_44 = arith.constant -5.000000e-01 : f32
    %70 = vector.broadcast %cst_44 : f32 to vector<16x32xf32>
    %71 = arith.mulf %70, %62 : vector<16x32xf32>
    %72 = vector.broadcast %44 : vector<1x32xf32> to vector<16x32xf32>
    %73 = arith.mulf %71, %72 : vector<16x32xf32>
    %74 = math.exp %73 : vector<16x32xf32>
    %75 = vector.broadcast %42 : vector<1x32xf32> to vector<16x32xf32>
    %76 = arith.mulf %75, %74 : vector<16x32xf32>
    %77 = tpu.concatenate %76, %76, %76, %76 in 0 : vector<16x32xf32>, vector<16x32xf32>, vector<16x32xf32>, vector<16x32xf32> -> vector<64x32xf32>
    %78 = arith.mulf %77, %5 : vector<64x32xf32>
    %cst_45 = arith.constant dense<0.000000e+00> : vector<16x64xf32>
    %79 = tpu.matmul %69, %78, %cst_45 {dimension_numbers = #tpu.dot_dimension_numbers<[1], [1], [0], [0], [0, 0, 1, 0], [], []>} : vector<16x32xf32>, vector<64x32xf32>, vector<16x64xf32> -> vector<16x64xf32>
    %cst_46 = arith.constant dense<0xFF800000> : vector<16xf32>
    %80 = vector.multi_reduction <maximumf>, %79, %cst_46 [1] : vector<16x64xf32> to vector<16xf32>
    %81 = vector.shape_cast %80 : vector<16xf32> to vector<16x1xf32>
    %82 = vector.broadcast %81 : vector<16x1xf32> to vector<16x64xf32>
    %83 = arith.subf %79, %82 : vector<16x64xf32>
    %84 = math.exp %83 : vector<16x64xf32>
    %cst_47 = arith.constant dense<0.000000e+00> : vector<16x64xf32>
    %85 = tpu.matmul %84, %7, %cst_47 {dimension_numbers = #tpu.dot_dimension_numbers<[1], [0], [0], [1], [0, 0, 1, 1], [], []>} : vector<16x64xf32>, vector<64x64xf32>, vector<16x64xf32> -> vector<16x64xf32>
    %86 = arith.divf %84, %85 : vector<16x64xf32>
    %87 = tpu.concatenate %33, %33, %33, %33 in 0 : vector<16x32xf32>, vector<16x32xf32>, vector<16x32xf32>, vector<16x32xf32> -> vector<64x32xf32>
    %88 = arith.mulf %87, %6 : vector<64x32xf32>
    %cst_48 = arith.constant dense<0.000000e+00> : vector<16x32xf32>
    %89 = tpu.matmul %86, %88, %cst_48 {dimension_numbers = #tpu.dot_dimension_numbers<[1], [0], [0], [1], [0, 0, 1, 1], [], []>} : vector<16x64xf32>, vector<64x32xf32>, vector<16x32xf32> -> vector<16x32xf32>
    %c0_49 = arith.constant 0 : index
    %c0_50 = arith.constant 0 : index
    %c0_51 = arith.constant 0 : index
    %90 = vector.load %arg9[%c0_49, %c0_50, %c0_51] : memref<2x32x32xf32, #tpu.memory_space<vmem>>, vector<1x32x32xf32>
    %91 = vector.shape_cast %90 : vector<1x32x32xf32> to vector<32x32xf32>
    %cst_52 = arith.constant dense<0.000000e+00> : vector<16x32xf32>
    %92 = tpu.matmul %89, %91, %cst_52 {dimension_numbers = #tpu.dot_dimension_numbers<[1], [0], [0], [1], [0, 0, 1, 1], [], []>} : vector<16x32xf32>, vector<32x32xf32>, vector<16x32xf32> -> vector<16x32xf32>
    %93 = arith.addf %1, %92 : vector<16x32xf32>
    %c0_53 = arith.constant 0 : index
    %c0_54 = arith.constant 0 : index
    %c0_55 = arith.constant 0 : index
    %94 = vector.load %arg15[%c0_53, %c0_54, %c0_55] : memref<2x1x32xf32, #tpu.memory_space<vmem>>, vector<1x1x32xf32>
    %95 = vector.shape_cast %94 : vector<1x1x32xf32> to vector<1x32xf32>
    %c0_56 = arith.constant 0 : index
    %c0_57 = arith.constant 0 : index
    %c0_58 = arith.constant 0 : index
    %96 = vector.load %arg16[%c0_56, %c0_57, %c0_58] : memref<2x1x32xf32, #tpu.memory_space<vmem>>, vector<1x1x32xf32>
    %97 = vector.shape_cast %96 : vector<1x1x32xf32> to vector<1x32xf32>
    %cst_59 = arith.constant dense<0.000000e+00> : vector<16xf32>
    %98 = vector.multi_reduction <add>, %93, %cst_59 [1] : vector<16x32xf32> to vector<16xf32>
    %99 = vector.shape_cast %98 : vector<16xf32> to vector<16x1xf32>
    %cst_60 = arith.constant 3.200000e+01 : f32
    %100 = vector.broadcast %cst_60 : f32 to vector<16x1xf32>
    %101 = arith.divf %99, %100 : vector<16x1xf32>
    %102 = vector.broadcast %101 : vector<16x1xf32> to vector<16x32xf32>
    %103 = arith.subf %93, %102 : vector<16x32xf32>
    %104 = arith.mulf %103, %103 : vector<16x32xf32>
    %cst_61 = arith.constant dense<0.000000e+00> : vector<16xf32>
    %105 = vector.multi_reduction <add>, %104, %cst_61 [1] : vector<16x32xf32> to vector<16xf32>
    %106 = vector.shape_cast %105 : vector<16xf32> to vector<16x1xf32>
    %cst_62 = arith.constant 3.200000e+01 : f32
    %107 = vector.broadcast %cst_62 : f32 to vector<16x1xf32>
    %108 = arith.divf %106, %107 : vector<16x1xf32>
    %cst_63 = arith.constant 9.99999974E-6 : f32
    %109 = vector.broadcast %cst_63 : f32 to vector<16x1xf32>
    %110 = arith.addf %108, %109 : vector<16x1xf32>
    %111 = math.rsqrt %110 : vector<16x1xf32>
    %112 = vector.broadcast %111 : vector<16x1xf32> to vector<16x32xf32>
    %113 = arith.mulf %103, %112 : vector<16x32xf32>
    %114 = vector.broadcast %95 : vector<1x32xf32> to vector<16x32xf32>
    %115 = arith.mulf %113, %114 : vector<16x32xf32>
    %116 = vector.broadcast %97 : vector<1x32xf32> to vector<16x32xf32>
    %117 = arith.addf %115, %116 : vector<16x32xf32>
    %c0_64 = arith.constant 0 : index
    %c0_65 = arith.constant 0 : index
    %c0_66 = arith.constant 0 : index
    %118 = vector.load %arg17[%c0_64, %c0_65, %c0_66] : memref<2x32x128xf32, #tpu.memory_space<vmem>>, vector<1x32x128xf32>
    %119 = vector.shape_cast %118 : vector<1x32x128xf32> to vector<32x128xf32>
    %cst_67 = arith.constant dense<0.000000e+00> : vector<16x128xf32>
    %120 = tpu.matmul %117, %119, %cst_67 {dimension_numbers = #tpu.dot_dimension_numbers<[1], [0], [0], [1], [0, 0, 1, 1], [], []>} : vector<16x32xf32>, vector<32x128xf32>, vector<16x128xf32> -> vector<16x128xf32>
    %c0_68 = arith.constant 0 : index
    %c0_69 = arith.constant 0 : index
    %c0_70 = arith.constant 0 : index
    %121 = vector.load %arg18[%c0_68, %c0_69, %c0_70] : memref<2x1x128xf32, #tpu.memory_space<vmem>>, vector<1x1x128xf32>
    %122 = vector.shape_cast %121 : vector<1x1x128xf32> to vector<1x128xf32>
    %123 = vector.broadcast %122 : vector<1x128xf32> to vector<16x128xf32>
    %124 = arith.addf %120, %123 : vector<16x128xf32>
    %cst_71 = arith.constant 5.000000e-01 : f32
    %125 = vector.broadcast %cst_71 : f32 to vector<16x128xf32>
    %126 = arith.mulf %125, %124 : vector<16x128xf32>
    %cst_72 = arith.constant 0.707106769 : f32
    %127 = vector.broadcast %cst_72 : f32 to vector<16x128xf32>
    %128 = arith.mulf %124, %127 : vector<16x128xf32>
    %129 = math.erf %128 : vector<16x128xf32>
    %cst_73 = arith.constant 1.000000e+00 : f32
    %130 = vector.broadcast %cst_73 : f32 to vector<16x128xf32>
    %131 = arith.addf %130, %129 : vector<16x128xf32>
    %132 = arith.mulf %126, %131 : vector<16x128xf32>
    %c0_74 = arith.constant 0 : index
    %c0_75 = arith.constant 0 : index
    %c0_76 = arith.constant 0 : index
    %133 = vector.load %arg19[%c0_74, %c0_75, %c0_76] : memref<2x128x32xf32, #tpu.memory_space<vmem>>, vector<1x128x32xf32>
    %134 = vector.shape_cast %133 : vector<1x128x32xf32> to vector<128x32xf32>
    %cst_77 = arith.constant dense<0.000000e+00> : vector<16x32xf32>
    %135 = tpu.matmul %132, %134, %cst_77 {dimension_numbers = #tpu.dot_dimension_numbers<[1], [0], [0], [1], [0, 0, 1, 1], [], []>} : vector<16x128xf32>, vector<128x32xf32>, vector<16x32xf32> -> vector<16x32xf32>
    %c0_78 = arith.constant 0 : index
    %c0_79 = arith.constant 0 : index
    %c0_80 = arith.constant 0 : index
    %136 = vector.load %arg20[%c0_78, %c0_79, %c0_80] : memref<2x1x32xf32, #tpu.memory_space<vmem>>, vector<1x1x32xf32>
    %137 = vector.shape_cast %136 : vector<1x1x32xf32> to vector<1x32xf32>
    %138 = vector.broadcast %137 : vector<1x32xf32> to vector<16x32xf32>
    %139 = arith.addf %135, %138 : vector<16x32xf32>
    %140 = arith.addf %117, %139 : vector<16x32xf32>
    %c0_81 = arith.constant 0 : index
    %c0_82 = arith.constant 0 : index
    %c0_83 = arith.constant 0 : index
    %141 = vector.load %arg21[%c0_81, %c0_82, %c0_83] : memref<2x1x32xf32, #tpu.memory_space<vmem>>, vector<1x1x32xf32>
    %142 = vector.shape_cast %141 : vector<1x1x32xf32> to vector<1x32xf32>
    %c0_84 = arith.constant 0 : index
    %c0_85 = arith.constant 0 : index
    %c0_86 = arith.constant 0 : index
    %143 = vector.load %arg22[%c0_84, %c0_85, %c0_86] : memref<2x1x32xf32, #tpu.memory_space<vmem>>, vector<1x1x32xf32>
    %144 = vector.shape_cast %143 : vector<1x1x32xf32> to vector<1x32xf32>
    %cst_87 = arith.constant dense<0.000000e+00> : vector<16xf32>
    %145 = vector.multi_reduction <add>, %140, %cst_87 [1] : vector<16x32xf32> to vector<16xf32>
    %146 = vector.shape_cast %145 : vector<16xf32> to vector<16x1xf32>
    %cst_88 = arith.constant 3.200000e+01 : f32
    %147 = vector.broadcast %cst_88 : f32 to vector<16x1xf32>
    %148 = arith.divf %146, %147 : vector<16x1xf32>
    %149 = vector.broadcast %148 : vector<16x1xf32> to vector<16x32xf32>
    %150 = arith.subf %140, %149 : vector<16x32xf32>
    %151 = arith.mulf %150, %150 : vector<16x32xf32>
    %cst_89 = arith.constant dense<0.000000e+00> : vector<16xf32>
    %152 = vector.multi_reduction <add>, %151, %cst_89 [1] : vector<16x32xf32> to vector<16xf32>
    %153 = vector.shape_cast %152 : vector<16xf32> to vector<16x1xf32>
    %cst_90 = arith.constant 3.200000e+01 : f32
    %154 = vector.broadcast %cst_90 : f32 to vector<16x1xf32>
    %155 = arith.divf %153, %154 : vector<16x1xf32>
    %cst_91 = arith.constant 9.99999974E-6 : f32
    %156 = vector.broadcast %cst_91 : f32 to vector<16x1xf32>
    %157 = arith.addf %155, %156 : vector<16x1xf32>
    %158 = math.rsqrt %157 : vector<16x1xf32>
    %159 = vector.broadcast %158 : vector<16x1xf32> to vector<16x32xf32>
    %160 = arith.mulf %150, %159 : vector<16x32xf32>
    %161 = vector.broadcast %142 : vector<1x32xf32> to vector<16x32xf32>
    %162 = arith.mulf %160, %161 : vector<16x32xf32>
    %163 = vector.broadcast %144 : vector<1x32xf32> to vector<16x32xf32>
    %164 = arith.addf %162, %163 : vector<16x32xf32>
    %cst_92 = arith.constant dense<0.000000e+00> : vector<16x32xf32>
    %165 = tpu.matmul %2, %164, %cst_92 {dimension_numbers = #tpu.dot_dimension_numbers<[1], [0], [0], [1], [0, 0, 1, 1], [], []>} : vector<16x16xf32>, vector<16x32xf32>, vector<16x32xf32> -> vector<16x32xf32>
    %166 = arith.subf %164, %165 : vector<16x32xf32>
    %167 = arith.mulf %166, %166 : vector<16x32xf32>
    %cst_93 = arith.constant dense<0.000000e+00> : vector<16xf32>
    %168 = vector.multi_reduction <add>, %167, %cst_93 [1] : vector<16x32xf32> to vector<16xf32>
    %169 = vector.shape_cast %168 : vector<16xf32> to vector<16x1xf32>
    %170 = math.sqrt %169 : vector<16x1xf32>
    %cst_94 = arith.constant 9.99999993E-9 : f32
    %171 = vector.broadcast %cst_94 : f32 to vector<16x1xf32>
    %172 = arith.maximumf %170, %171 : vector<16x1xf32>
    %173 = vector.broadcast %172 : vector<16x1xf32> to vector<16x32xf32>
    %174 = arith.divf %166, %173 : vector<16x32xf32>
    %175 = math.tanh %170 : vector<16x1xf32>
    %cst_95 = arith.constant dense<0.000000e+00> : vector<16x1xf32>
    %176 = tpu.matmul %3, %175, %cst_95 {dimension_numbers = #tpu.dot_dimension_numbers<[1], [0], [0], [1], [0, 0, 1, 1], [], []>} : vector<16x16xf32>, vector<16x1xf32>, vector<16x1xf32> -> vector<16x1xf32>
    %cst_96 = arith.constant 9.99999993E-9 : f32
    %177 = vector.broadcast %cst_96 : f32 to vector<16x1xf32>
    %178 = arith.maximumf %176, %177 : vector<16x1xf32>
    %179 = vector.broadcast %175 : vector<16x1xf32> to vector<16x32xf32>
    %180 = arith.mulf %179, %174 : vector<16x32xf32>
    %cst_97 = arith.constant dense<0.000000e+00> : vector<16x32xf32>
    %181 = tpu.matmul %3, %180, %cst_97 {dimension_numbers = #tpu.dot_dimension_numbers<[1], [0], [0], [1], [0, 0, 1, 1], [], []>} : vector<16x16xf32>, vector<16x32xf32>, vector<16x32xf32> -> vector<16x32xf32>
    %182 = vector.broadcast %178 : vector<16x1xf32> to vector<16x32xf32>
    %183 = arith.divf %181, %182 : vector<16x32xf32>
    %c1 = arith.constant 1 : index
    %c0_98 = arith.constant 0 : index
    %c0_99 = arith.constant 0 : index
    %184 = vector.load %arg8[%c1, %c0_98, %c0_99] : memref<2x32x96xf32, #tpu.memory_space<vmem>>, vector<1x32x96xf32>
    %185 = vector.shape_cast %184 : vector<1x32x96xf32> to vector<32x96xf32>
    %cst_100 = arith.constant dense<0.000000e+00> : vector<16x96xf32>
    %186 = tpu.matmul %164, %185, %cst_100 {dimension_numbers = #tpu.dot_dimension_numbers<[1], [0], [0], [1], [0, 0, 1, 1], [], []>} : vector<16x32xf32>, vector<32x96xf32>, vector<16x96xf32> -> vector<16x96xf32>
    %187 = vector.extract_strided_slice %186 {offsets = [0, 0], sizes = [16, 32], strides = [1, 1]} : vector<16x96xf32> to vector<16x32xf32>
    %188 = vector.extract_strided_slice %186 {offsets = [0, 32], sizes = [16, 32], strides = [1, 1]} : vector<16x96xf32> to vector<16x32xf32>
    %189 = vector.extract_strided_slice %186 {offsets = [0, 64], sizes = [16, 32], strides = [1, 1]} : vector<16x96xf32> to vector<16x32xf32>
    %190 = vector.extract_strided_slice %8 {offsets = [1, 0], sizes = [1, 1], strides = [1, 1]} : vector<2x1xf32> to vector<1x1xf32>
    %191 = vector.broadcast %190 : vector<1x1xf32> to vector<16x32xf32>
    %192 = arith.mulf %191, %183 : vector<16x32xf32>
    %193 = arith.addf %187, %192 : vector<16x32xf32>
    %194 = arith.addf %188, %192 : vector<16x32xf32>
    %c1_101 = arith.constant 1 : index
    %c0_102 = arith.constant 0 : index
    %c0_103 = arith.constant 0 : index
    %195 = vector.load %arg11[%c1_101, %c0_102, %c0_103] : memref<2x1x32xf32, #tpu.memory_space<vmem>>, vector<1x1x32xf32>
    %196 = vector.shape_cast %195 : vector<1x1x32xf32> to vector<1x32xf32>
    %c1_104 = arith.constant 1 : index
    %c0_105 = arith.constant 0 : index
    %c0_106 = arith.constant 0 : index
    %197 = vector.load %arg12[%c1_104, %c0_105, %c0_106] : memref<2x1x32xf32, #tpu.memory_space<vmem>>, vector<1x1x32xf32>
    %198 = vector.shape_cast %197 : vector<1x1x32xf32> to vector<1x32xf32>
    %c1_107 = arith.constant 1 : index
    %c0_108 = arith.constant 0 : index
    %c0_109 = arith.constant 0 : index
    %199 = vector.load %arg13[%c1_107, %c0_108, %c0_109] : memref<2x1x32xf32, #tpu.memory_space<vmem>>, vector<1x1x32xf32>
    %200 = vector.shape_cast %199 : vector<1x1x32xf32> to vector<1x32xf32>
    %c1_110 = arith.constant 1 : index
    %c0_111 = arith.constant 0 : index
    %c0_112 = arith.constant 0 : index
    %201 = vector.load %arg10[%c1_110, %c0_111, %c0_112] : memref<2x32x32xf32, #tpu.memory_space<vmem>>, vector<1x32x32xf32>
    %202 = vector.shape_cast %201 : vector<1x32x32xf32> to vector<32x32xf32>
    %203 = arith.mulf %193, %193 : vector<16x32xf32>
    %cst_113 = arith.constant dense<0.000000e+00> : vector<16x32xf32>
    %204 = tpu.matmul %203, %4, %cst_113 {dimension_numbers = #tpu.dot_dimension_numbers<[1], [0], [0], [1], [0, 0, 1, 1], [], []>} : vector<16x32xf32>, vector<32x32xf32>, vector<16x32xf32> -> vector<16x32xf32>
    %205 = vector.broadcast %196 : vector<1x32xf32> to vector<16x32xf32>
    %206 = arith.addf %204, %205 : vector<16x32xf32>
    %cst_114 = arith.constant dense<0.000000e+00> : vector<16x32xf32>
    %207 = tpu.matmul %193, %202, %cst_114 {dimension_numbers = #tpu.dot_dimension_numbers<[1], [0], [0], [1], [0, 0, 1, 1], [], []>} : vector<16x32xf32>, vector<32x32xf32>, vector<16x32xf32> -> vector<16x32xf32>
    %cst_115 = arith.constant 2.000000e+00 : f32
    %208 = vector.broadcast %cst_115 : f32 to vector<16x32xf32>
    %209 = arith.mulf %208, %207 : vector<16x32xf32>
    %210 = arith.subf %206, %209 : vector<16x32xf32>
    %211 = arith.mulf %194, %194 : vector<16x32xf32>
    %cst_116 = arith.constant dense<0.000000e+00> : vector<16x32xf32>
    %212 = tpu.matmul %211, %4, %cst_116 {dimension_numbers = #tpu.dot_dimension_numbers<[1], [0], [0], [1], [0, 0, 1, 1], [], []>} : vector<16x32xf32>, vector<32x32xf32>, vector<16x32xf32> -> vector<16x32xf32>
    %213 = vector.broadcast %196 : vector<1x32xf32> to vector<16x32xf32>
    %214 = arith.addf %212, %213 : vector<16x32xf32>
    %cst_117 = arith.constant dense<0.000000e+00> : vector<16x32xf32>
    %215 = tpu.matmul %194, %202, %cst_117 {dimension_numbers = #tpu.dot_dimension_numbers<[1], [0], [0], [1], [0, 0, 1, 1], [], []>} : vector<16x32xf32>, vector<32x32xf32>, vector<16x32xf32> -> vector<16x32xf32>
    %cst_118 = arith.constant 2.000000e+00 : f32
    %216 = vector.broadcast %cst_118 : f32 to vector<16x32xf32>
    %217 = arith.mulf %216, %215 : vector<16x32xf32>
    %218 = arith.subf %214, %217 : vector<16x32xf32>
    %cst_119 = arith.constant -5.000000e-01 : f32
    %219 = vector.broadcast %cst_119 : f32 to vector<16x32xf32>
    %220 = arith.mulf %219, %210 : vector<16x32xf32>
    %221 = vector.broadcast %200 : vector<1x32xf32> to vector<16x32xf32>
    %222 = arith.mulf %220, %221 : vector<16x32xf32>
    %223 = math.exp %222 : vector<16x32xf32>
    %224 = vector.broadcast %198 : vector<1x32xf32> to vector<16x32xf32>
    %225 = arith.mulf %224, %223 : vector<16x32xf32>
    %cst_120 = arith.constant -5.000000e-01 : f32
    %226 = vector.broadcast %cst_120 : f32 to vector<16x32xf32>
    %227 = arith.mulf %226, %218 : vector<16x32xf32>
    %228 = vector.broadcast %200 : vector<1x32xf32> to vector<16x32xf32>
    %229 = arith.mulf %227, %228 : vector<16x32xf32>
    %230 = math.exp %229 : vector<16x32xf32>
    %231 = vector.broadcast %198 : vector<1x32xf32> to vector<16x32xf32>
    %232 = arith.mulf %231, %230 : vector<16x32xf32>
    %233 = tpu.concatenate %232, %232, %232, %232 in 0 : vector<16x32xf32>, vector<16x32xf32>, vector<16x32xf32>, vector<16x32xf32> -> vector<64x32xf32>
    %234 = arith.mulf %233, %5 : vector<64x32xf32>
    %cst_121 = arith.constant dense<0.000000e+00> : vector<16x64xf32>
    %235 = tpu.matmul %225, %234, %cst_121 {dimension_numbers = #tpu.dot_dimension_numbers<[1], [1], [0], [0], [0, 0, 1, 0], [], []>} : vector<16x32xf32>, vector<64x32xf32>, vector<16x64xf32> -> vector<16x64xf32>
    %cst_122 = arith.constant dense<0xFF800000> : vector<16xf32>
    %236 = vector.multi_reduction <maximumf>, %235, %cst_122 [1] : vector<16x64xf32> to vector<16xf32>
    %237 = vector.shape_cast %236 : vector<16xf32> to vector<16x1xf32>
    %238 = vector.broadcast %237 : vector<16x1xf32> to vector<16x64xf32>
    %239 = arith.subf %235, %238 : vector<16x64xf32>
    %240 = math.exp %239 : vector<16x64xf32>
    %cst_123 = arith.constant dense<0.000000e+00> : vector<16x64xf32>
    %241 = tpu.matmul %240, %7, %cst_123 {dimension_numbers = #tpu.dot_dimension_numbers<[1], [0], [0], [1], [0, 0, 1, 1], [], []>} : vector<16x64xf32>, vector<64x64xf32>, vector<16x64xf32> -> vector<16x64xf32>
    %242 = arith.divf %240, %241 : vector<16x64xf32>
    %243 = tpu.concatenate %189, %189, %189, %189 in 0 : vector<16x32xf32>, vector<16x32xf32>, vector<16x32xf32>, vector<16x32xf32> -> vector<64x32xf32>
    %244 = arith.mulf %243, %6 : vector<64x32xf32>
    %cst_124 = arith.constant dense<0.000000e+00> : vector<16x32xf32>
    %245 = tpu.matmul %242, %244, %cst_124 {dimension_numbers = #tpu.dot_dimension_numbers<[1], [0], [0], [1], [0, 0, 1, 1], [], []>} : vector<16x64xf32>, vector<64x32xf32>, vector<16x32xf32> -> vector<16x32xf32>
    %c1_125 = arith.constant 1 : index
    %c0_126 = arith.constant 0 : index
    %c0_127 = arith.constant 0 : index
    %246 = vector.load %arg9[%c1_125, %c0_126, %c0_127] : memref<2x32x32xf32, #tpu.memory_space<vmem>>, vector<1x32x32xf32>
    %247 = vector.shape_cast %246 : vector<1x32x32xf32> to vector<32x32xf32>
    %cst_128 = arith.constant dense<0.000000e+00> : vector<16x32xf32>
    %248 = tpu.matmul %245, %247, %cst_128 {dimension_numbers = #tpu.dot_dimension_numbers<[1], [0], [0], [1], [0, 0, 1, 1], [], []>} : vector<16x32xf32>, vector<32x32xf32>, vector<16x32xf32> -> vector<16x32xf32>
    %249 = arith.addf %164, %248 : vector<16x32xf32>
    %c1_129 = arith.constant 1 : index
    %c0_130 = arith.constant 0 : index
    %c0_131 = arith.constant 0 : index
    %250 = vector.load %arg15[%c1_129, %c0_130, %c0_131] : memref<2x1x32xf32, #tpu.memory_space<vmem>>, vector<1x1x32xf32>
    %251 = vector.shape_cast %250 : vector<1x1x32xf32> to vector<1x32xf32>
    %c1_132 = arith.constant 1 : index
    %c0_133 = arith.constant 0 : index
    %c0_134 = arith.constant 0 : index
    %252 = vector.load %arg16[%c1_132, %c0_133, %c0_134] : memref<2x1x32xf32, #tpu.memory_space<vmem>>, vector<1x1x32xf32>
    %253 = vector.shape_cast %252 : vector<1x1x32xf32> to vector<1x32xf32>
    %cst_135 = arith.constant dense<0.000000e+00> : vector<16xf32>
    %254 = vector.multi_reduction <add>, %249, %cst_135 [1] : vector<16x32xf32> to vector<16xf32>
    %255 = vector.shape_cast %254 : vector<16xf32> to vector<16x1xf32>
    %cst_136 = arith.constant 3.200000e+01 : f32
    %256 = vector.broadcast %cst_136 : f32 to vector<16x1xf32>
    %257 = arith.divf %255, %256 : vector<16x1xf32>
    %258 = vector.broadcast %257 : vector<16x1xf32> to vector<16x32xf32>
    %259 = arith.subf %249, %258 : vector<16x32xf32>
    %260 = arith.mulf %259, %259 : vector<16x32xf32>
    %cst_137 = arith.constant dense<0.000000e+00> : vector<16xf32>
    %261 = vector.multi_reduction <add>, %260, %cst_137 [1] : vector<16x32xf32> to vector<16xf32>
    %262 = vector.shape_cast %261 : vector<16xf32> to vector<16x1xf32>
    %cst_138 = arith.constant 3.200000e+01 : f32
    %263 = vector.broadcast %cst_138 : f32 to vector<16x1xf32>
    %264 = arith.divf %262, %263 : vector<16x1xf32>
    %cst_139 = arith.constant 9.99999974E-6 : f32
    %265 = vector.broadcast %cst_139 : f32 to vector<16x1xf32>
    %266 = arith.addf %264, %265 : vector<16x1xf32>
    %267 = math.rsqrt %266 : vector<16x1xf32>
    %268 = vector.broadcast %267 : vector<16x1xf32> to vector<16x32xf32>
    %269 = arith.mulf %259, %268 : vector<16x32xf32>
    %270 = vector.broadcast %251 : vector<1x32xf32> to vector<16x32xf32>
    %271 = arith.mulf %269, %270 : vector<16x32xf32>
    %272 = vector.broadcast %253 : vector<1x32xf32> to vector<16x32xf32>
    %273 = arith.addf %271, %272 : vector<16x32xf32>
    %c1_140 = arith.constant 1 : index
    %c0_141 = arith.constant 0 : index
    %c0_142 = arith.constant 0 : index
    %274 = vector.load %arg17[%c1_140, %c0_141, %c0_142] : memref<2x32x128xf32, #tpu.memory_space<vmem>>, vector<1x32x128xf32>
    %275 = vector.shape_cast %274 : vector<1x32x128xf32> to vector<32x128xf32>
    %cst_143 = arith.constant dense<0.000000e+00> : vector<16x128xf32>
    %276 = tpu.matmul %273, %275, %cst_143 {dimension_numbers = #tpu.dot_dimension_numbers<[1], [0], [0], [1], [0, 0, 1, 1], [], []>} : vector<16x32xf32>, vector<32x128xf32>, vector<16x128xf32> -> vector<16x128xf32>
    %c1_144 = arith.constant 1 : index
    %c0_145 = arith.constant 0 : index
    %c0_146 = arith.constant 0 : index
    %277 = vector.load %arg18[%c1_144, %c0_145, %c0_146] : memref<2x1x128xf32, #tpu.memory_space<vmem>>, vector<1x1x128xf32>
    %278 = vector.shape_cast %277 : vector<1x1x128xf32> to vector<1x128xf32>
    %279 = vector.broadcast %278 : vector<1x128xf32> to vector<16x128xf32>
    %280 = arith.addf %276, %279 : vector<16x128xf32>
    %cst_147 = arith.constant 5.000000e-01 : f32
    %281 = vector.broadcast %cst_147 : f32 to vector<16x128xf32>
    %282 = arith.mulf %281, %280 : vector<16x128xf32>
    %cst_148 = arith.constant 0.707106769 : f32
    %283 = vector.broadcast %cst_148 : f32 to vector<16x128xf32>
    %284 = arith.mulf %280, %283 : vector<16x128xf32>
    %285 = math.erf %284 : vector<16x128xf32>
    %cst_149 = arith.constant 1.000000e+00 : f32
    %286 = vector.broadcast %cst_149 : f32 to vector<16x128xf32>
    %287 = arith.addf %286, %285 : vector<16x128xf32>
    %288 = arith.mulf %282, %287 : vector<16x128xf32>
    %c1_150 = arith.constant 1 : index
    %c0_151 = arith.constant 0 : index
    %c0_152 = arith.constant 0 : index
    %289 = vector.load %arg19[%c1_150, %c0_151, %c0_152] : memref<2x128x32xf32, #tpu.memory_space<vmem>>, vector<1x128x32xf32>
    %290 = vector.shape_cast %289 : vector<1x128x32xf32> to vector<128x32xf32>
    %cst_153 = arith.constant dense<0.000000e+00> : vector<16x32xf32>
    %291 = tpu.matmul %288, %290, %cst_153 {dimension_numbers = #tpu.dot_dimension_numbers<[1], [0], [0], [1], [0, 0, 1, 1], [], []>} : vector<16x128xf32>, vector<128x32xf32>, vector<16x32xf32> -> vector<16x32xf32>
    %c1_154 = arith.constant 1 : index
    %c0_155 = arith.constant 0 : index
    %c0_156 = arith.constant 0 : index
    %292 = vector.load %arg20[%c1_154, %c0_155, %c0_156] : memref<2x1x32xf32, #tpu.memory_space<vmem>>, vector<1x1x32xf32>
    %293 = vector.shape_cast %292 : vector<1x1x32xf32> to vector<1x32xf32>
    %294 = vector.broadcast %293 : vector<1x32xf32> to vector<16x32xf32>
    %295 = arith.addf %291, %294 : vector<16x32xf32>
    %296 = arith.addf %273, %295 : vector<16x32xf32>
    %c1_157 = arith.constant 1 : index
    %c0_158 = arith.constant 0 : index
    %c0_159 = arith.constant 0 : index
    %297 = vector.load %arg21[%c1_157, %c0_158, %c0_159] : memref<2x1x32xf32, #tpu.memory_space<vmem>>, vector<1x1x32xf32>
    %298 = vector.shape_cast %297 : vector<1x1x32xf32> to vector<1x32xf32>
    %c1_160 = arith.constant 1 : index
    %c0_161 = arith.constant 0 : index
    %c0_162 = arith.constant 0 : index
    %299 = vector.load %arg22[%c1_160, %c0_161, %c0_162] : memref<2x1x32xf32, #tpu.memory_space<vmem>>, vector<1x1x32xf32>
    %300 = vector.shape_cast %299 : vector<1x1x32xf32> to vector<1x32xf32>
    %cst_163 = arith.constant dense<0.000000e+00> : vector<16xf32>
    %301 = vector.multi_reduction <add>, %296, %cst_163 [1] : vector<16x32xf32> to vector<16xf32>
    %302 = vector.shape_cast %301 : vector<16xf32> to vector<16x1xf32>
    %cst_164 = arith.constant 3.200000e+01 : f32
    %303 = vector.broadcast %cst_164 : f32 to vector<16x1xf32>
    %304 = arith.divf %302, %303 : vector<16x1xf32>
    %305 = vector.broadcast %304 : vector<16x1xf32> to vector<16x32xf32>
    %306 = arith.subf %296, %305 : vector<16x32xf32>
    %307 = arith.mulf %306, %306 : vector<16x32xf32>
    %cst_165 = arith.constant dense<0.000000e+00> : vector<16xf32>
    %308 = vector.multi_reduction <add>, %307, %cst_165 [1] : vector<16x32xf32> to vector<16xf32>
    %309 = vector.shape_cast %308 : vector<16xf32> to vector<16x1xf32>
    %cst_166 = arith.constant 3.200000e+01 : f32
    %310 = vector.broadcast %cst_166 : f32 to vector<16x1xf32>
    %311 = arith.divf %309, %310 : vector<16x1xf32>
    %cst_167 = arith.constant 9.99999974E-6 : f32
    %312 = vector.broadcast %cst_167 : f32 to vector<16x1xf32>
    %313 = arith.addf %311, %312 : vector<16x1xf32>
    %314 = math.rsqrt %313 : vector<16x1xf32>
    %315 = vector.broadcast %314 : vector<16x1xf32> to vector<16x32xf32>
    %316 = arith.mulf %306, %315 : vector<16x32xf32>
    %317 = vector.broadcast %298 : vector<1x32xf32> to vector<16x32xf32>
    %318 = arith.mulf %316, %317 : vector<16x32xf32>
    %319 = vector.broadcast %300 : vector<1x32xf32> to vector<16x32xf32>
    %320 = arith.addf %318, %319 : vector<16x32xf32>
    %c0_168 = arith.constant 0 : index
    %c0_169 = arith.constant 0 : index
    %321 = vector.load %arg23[%c0_168, %c0_169] : memref<1x32xf32, #tpu.memory_space<vmem>>, vector<1x32xf32>
    %c0_170 = arith.constant 0 : index
    %c0_171 = arith.constant 0 : index
    %322 = vector.load %arg24[%c0_170, %c0_171] : memref<1x32xf32, #tpu.memory_space<vmem>>, vector<1x32xf32>
    %cst_172 = arith.constant dense<0.000000e+00> : vector<16xf32>
    %323 = vector.multi_reduction <add>, %320, %cst_172 [1] : vector<16x32xf32> to vector<16xf32>
    %324 = vector.shape_cast %323 : vector<16xf32> to vector<16x1xf32>
    %cst_173 = arith.constant 3.200000e+01 : f32
    %325 = vector.broadcast %cst_173 : f32 to vector<16x1xf32>
    %326 = arith.divf %324, %325 : vector<16x1xf32>
    %327 = vector.broadcast %326 : vector<16x1xf32> to vector<16x32xf32>
    %328 = arith.subf %320, %327 : vector<16x32xf32>
    %329 = arith.mulf %328, %328 : vector<16x32xf32>
    %cst_174 = arith.constant dense<0.000000e+00> : vector<16xf32>
    %330 = vector.multi_reduction <add>, %329, %cst_174 [1] : vector<16x32xf32> to vector<16xf32>
    %331 = vector.shape_cast %330 : vector<16xf32> to vector<16x1xf32>
    %cst_175 = arith.constant 3.200000e+01 : f32
    %332 = vector.broadcast %cst_175 : f32 to vector<16x1xf32>
    %333 = arith.divf %331, %332 : vector<16x1xf32>
    %cst_176 = arith.constant 9.99999974E-6 : f32
    %334 = vector.broadcast %cst_176 : f32 to vector<16x1xf32>
    %335 = arith.addf %333, %334 : vector<16x1xf32>
    %336 = math.rsqrt %335 : vector<16x1xf32>
    %337 = vector.broadcast %336 : vector<16x1xf32> to vector<16x32xf32>
    %338 = arith.mulf %328, %337 : vector<16x32xf32>
    %339 = vector.broadcast %321 : vector<1x32xf32> to vector<16x32xf32>
    %340 = arith.mulf %338, %339 : vector<16x32xf32>
    %341 = vector.broadcast %322 : vector<1x32xf32> to vector<16x32xf32>
    %342 = arith.addf %340, %341 : vector<16x32xf32>
    %c0_177 = arith.constant 0 : index
    %c0_178 = arith.constant 0 : index
    %343 = vector.load %arg25[%c0_177, %c0_178] : memref<32x128xf32, #tpu.memory_space<vmem>>, vector<32x128xf32>
    %cst_179 = arith.constant dense<0.000000e+00> : vector<16x128xf32>
    %344 = tpu.matmul %342, %343, %cst_179 {dimension_numbers = #tpu.dot_dimension_numbers<[1], [0], [0], [1], [0, 0, 1, 1], [], []>} : vector<16x32xf32>, vector<32x128xf32>, vector<16x128xf32> -> vector<16x128xf32>
    %c0_180 = arith.constant 0 : index
    %c0_181 = arith.constant 0 : index
    %c0_182 = arith.constant 0 : index
    %345 = vector.load %arg26[%c0_180, %c0_181, %c0_182] : memref<1x16x128xf32, #tpu.memory_space<vmem>>, vector<1x16x128xf32>
    %346 = vector.shape_cast %345 : vector<1x16x128xf32> to vector<16x128xf32>
    %347 = vector.shape_cast %344 : vector<16x128xf32> to vector<1x16x128xf32>
    tpu.vector_store %arg26[%c0_180, %c0_181, %c0_182], %347 {strides = array<i32>} : memref<1x16x128xf32, #tpu.memory_space<vmem>>, vector<1x16x128xf32>,
    return
  }
  func.func @transform_0(%arg0: i32) -> (i32, i32, i32) {
    %c0_i32 = arith.constant 0 : i32
    %c0_i32_0 = arith.constant 0 : i32
    %c0_i32_1 = arith.constant 0 : i32
    return %arg0, %c0_i32, %c0_i32_0 : i32, i32, i32
  }
  func.func @transform_1(%arg0: i32) -> (i32, i32) {
    %c0_i32 = arith.constant 0 : i32
    %c0_i32_0 = arith.constant 0 : i32
    %c0_i32_1 = arith.constant 0 : i32
    return %c0_i32, %c0_i32_0 : i32, i32
  }
  func.func @transform_2(%arg0: i32) -> (i32, i32) {
    %c0_i32 = arith.constant 0 : i32
    %c0_i32_0 = arith.constant 0 : i32
    %c0_i32_1 = arith.constant 0 : i32
    return %c0_i32, %c0_i32_0 : i32, i32
  }
  func.func @transform_3(%arg0: i32) -> (i32, i32) {
    %c0_i32 = arith.constant 0 : i32
    %c0_i32_0 = arith.constant 0 : i32
    %c0_i32_1 = arith.constant 0 : i32
    return %c0_i32, %c0_i32_0 : i32, i32
  }
  func.func @transform_4(%arg0: i32) -> (i32, i32) {
    %c0_i32 = arith.constant 0 : i32
    %c0_i32_0 = arith.constant 0 : i32
    %c0_i32_1 = arith.constant 0 : i32
    return %c0_i32, %c0_i32_0 : i32, i32
  }
  func.func @transform_5(%arg0: i32) -> (i32, i32) {
    %c0_i32 = arith.constant 0 : i32
    %c0_i32_0 = arith.constant 0 : i32
    %c0_i32_1 = arith.constant 0 : i32
    return %c0_i32, %c0_i32_0 : i32, i32
  }
  func.func @transform_6(%arg0: i32) -> (i32, i32) {
    %c0_i32 = arith.constant 0 : i32
    %c0_i32_0 = arith.constant 0 : i32
    %c0_i32_1 = arith.constant 0 : i32
    return %c0_i32, %c0_i32_0 : i32, i32
  }
  func.func @transform_7(%arg0: i32) -> (i32, i32, i32) {
    %c0_i32 = arith.constant 0 : i32
    %c0_i32_0 = arith.constant 0 : i32
    %c0_i32_1 = arith.constant 0 : i32
    %c0_i32_2 = arith.constant 0 : i32
    return %c0_i32, %c0_i32_0, %c0_i32_1 : i32, i32, i32
  }
  func.func @transform_8(%arg0: i32) -> (i32, i32, i32) {
    %c0_i32 = arith.constant 0 : i32
    %c0_i32_0 = arith.constant 0 : i32
    %c0_i32_1 = arith.constant 0 : i32
    %c0_i32_2 = arith.constant 0 : i32
    return %c0_i32, %c0_i32_0, %c0_i32_1 : i32, i32, i32
  }
  func.func @transform_9(%arg0: i32) -> (i32, i32, i32) {
    %c0_i32 = arith.constant 0 : i32
    %c0_i32_0 = arith.constant 0 : i32
    %c0_i32_1 = arith.constant 0 : i32
    %c0_i32_2 = arith.constant 0 : i32
    return %c0_i32, %c0_i32_0, %c0_i32_1 : i32, i32, i32
  }
  func.func @transform_10(%arg0: i32) -> (i32, i32, i32) {
    %c0_i32 = arith.constant 0 : i32
    %c0_i32_0 = arith.constant 0 : i32
    %c0_i32_1 = arith.constant 0 : i32
    %c0_i32_2 = arith.constant 0 : i32
    return %c0_i32, %c0_i32_0, %c0_i32_1 : i32, i32, i32
  }
  func.func @transform_11(%arg0: i32) -> (i32, i32, i32) {
    %c0_i32 = arith.constant 0 : i32
    %c0_i32_0 = arith.constant 0 : i32
    %c0_i32_1 = arith.constant 0 : i32
    %c0_i32_2 = arith.constant 0 : i32
    return %c0_i32, %c0_i32_0, %c0_i32_1 : i32, i32, i32
  }
  func.func @transform_12(%arg0: i32) -> (i32, i32, i32) {
    %c0_i32 = arith.constant 0 : i32
    %c0_i32_0 = arith.constant 0 : i32
    %c0_i32_1 = arith.constant 0 : i32
    %c0_i32_2 = arith.constant 0 : i32
    return %c0_i32, %c0_i32_0, %c0_i32_1 : i32, i32, i32
  }
  func.func @transform_13(%arg0: i32) -> (i32, i32) {
    %c0_i32 = arith.constant 0 : i32
    %c0_i32_0 = arith.constant 0 : i32
    %c0_i32_1 = arith.constant 0 : i32
    return %c0_i32, %c0_i32_0 : i32, i32
  }
  func.func @transform_14(%arg0: i32) -> (i32, i32, i32) {
    %c0_i32 = arith.constant 0 : i32
    %c0_i32_0 = arith.constant 0 : i32
    %c0_i32_1 = arith.constant 0 : i32
    %c0_i32_2 = arith.constant 0 : i32
    return %c0_i32, %c0_i32_0, %c0_i32_1 : i32, i32, i32
  }
  func.func @transform_15(%arg0: i32) -> (i32, i32, i32) {
    %c0_i32 = arith.constant 0 : i32
    %c0_i32_0 = arith.constant 0 : i32
    %c0_i32_1 = arith.constant 0 : i32
    %c0_i32_2 = arith.constant 0 : i32
    return %c0_i32, %c0_i32_0, %c0_i32_1 : i32, i32, i32
  }
  func.func @transform_16(%arg0: i32) -> (i32, i32, i32) {
    %c0_i32 = arith.constant 0 : i32
    %c0_i32_0 = arith.constant 0 : i32
    %c0_i32_1 = arith.constant 0 : i32
    %c0_i32_2 = arith.constant 0 : i32
    return %c0_i32, %c0_i32_0, %c0_i32_1 : i32, i32, i32
  }
  func.func @transform_17(%arg0: i32) -> (i32, i32, i32) {
    %c0_i32 = arith.constant 0 : i32
    %c0_i32_0 = arith.constant 0 : i32
    %c0_i32_1 = arith.constant 0 : i32
    %c0_i32_2 = arith.constant 0 : i32
    return %c0_i32, %c0_i32_0, %c0_i32_1 : i32, i32, i32
  }
  func.func @transform_18(%arg0: i32) -> (i32, i32, i32) {
    %c0_i32 = arith.constant 0 : i32
    %c0_i32_0 = arith.constant 0 : i32
    %c0_i32_1 = arith.constant 0 : i32
    %c0_i32_2 = arith.constant 0 : i32
    return %c0_i32, %c0_i32_0, %c0_i32_1 : i32, i32, i32
  }
  func.func @transform_19(%arg0: i32) -> (i32, i32, i32) {
    %c0_i32 = arith.constant 0 : i32
    %c0_i32_0 = arith.constant 0 : i32
    %c0_i32_1 = arith.constant 0 : i32
    %c0_i32_2 = arith.constant 0 : i32
    return %c0_i32, %c0_i32_0, %c0_i32_1 : i32, i32, i32
  }
  func.func @transform_20(%arg0: i32) -> (i32, i32, i32) {
    %c0_i32 = arith.constant 0 : i32
    %c0_i32_0 = arith.constant 0 : i32
    %c0_i32_1 = arith.constant 0 : i32
    %c0_i32_2 = arith.constant 0 : i32
    return %c0_i32, %c0_i32_0, %c0_i32_1 : i32, i32, i32
  }
  func.func @transform_21(%arg0: i32) -> (i32, i32, i32) {
    %c0_i32 = arith.constant 0 : i32
    %c0_i32_0 = arith.constant 0 : i32
    %c0_i32_1 = arith.constant 0 : i32
    %c0_i32_2 = arith.constant 0 : i32
    return %c0_i32, %c0_i32_0, %c0_i32_1 : i32, i32, i32
  }
  func.func @transform_22(%arg0: i32) -> (i32, i32) {
    %c0_i32 = arith.constant 0 : i32
    %c0_i32_0 = arith.constant 0 : i32
    %c0_i32_1 = arith.constant 0 : i32
    return %c0_i32, %c0_i32_0 : i32, i32
  }
  func.func @transform_23(%arg0: i32) -> (i32, i32) {
    %c0_i32 = arith.constant 0 : i32
    %c0_i32_0 = arith.constant 0 : i32
    %c0_i32_1 = arith.constant 0 : i32
    return %c0_i32, %c0_i32_0 : i32, i32
  }
  func.func @transform_24(%arg0: i32) -> (i32, i32) {
    %c0_i32 = arith.constant 0 : i32
    %c0_i32_0 = arith.constant 0 : i32
    %c0_i32_1 = arith.constant 0 : i32
    return %c0_i32, %c0_i32_0 : i32, i32
  }
  func.func @transform_25(%arg0: i32) -> (i32, i32, i32) {
    %c0_i32 = arith.constant 0 : i32
    %c0_i32_0 = arith.constant 0 : i32
    %c0_i32_1 = arith.constant 0 : i32
    return %arg0, %c0_i32, %c0_i32_0 : i32, i32, i32
  }
}

</mosaic_0001>

<bundles_post_ra>
// kernel: language_model_forward.1
= control target key start
LH: loop header
LB: loop body
LE: loop exit
PB: predicated region body
PF: predicated region fallthrough
CT: control target
= control target key end

     0   :  { %s6332_s0 = inlined_call_operand.vmem [shape: f32[2,16,32], index: 0, kind: input, shape index: {}]   ;;  %s6333_s1 = inlined_call_operand.vmem [shape: f32[16,16], index: 1, kind: input, shape index: {}]   ;;  %s6334_s2 = inlined_call_operand.vmem [shape: f32[16,16], index: 2, kind: input, shape index: {}]   ;;  %s6335_s3 = inlined_call_operand.vmem [shape: f32[32,32], index: 3, kind: input, shape index: {}]   ;;  %s6336_s4 = inlined_call_operand.vmem [shape: f32[64,32], index: 4, kind: input, shape index: {}]   ;;  %s6337_s5 = inlined_call_operand.vmem [shape: f32[64,32], index: 5, kind: input, shape index: {}]   ;;  %s6338_s6 = inlined_call_operand.vmem [shape: f32[64,64], index: 6, kind: input, shape index: {}]   ;;  %s6339_s7 = inlined_call_operand.vmem [shape: f32[2,32,96], index: 7, kind: input, shape index: {}]   ;;  %s6340_s8 = inlined_call_operand.vmem [shape: f32[2,32,32], index: 8, kind: input, shape index: {}]   ;;  %s6341_s9 = inlined_call_operand.vmem [shape: f32[2,32,32], index: 9, kind: input, shape index: {}]   ;;  %s6342_s10 = inlined_call_operand.vmem [shape: f32[2,1,32], index: 10, kind: input, shape index: {}]   ;;  %s6343_s11 = inlined_call_operand.vmem [shape: f32[2,1,32], index: 11, kind: input, shape index: {}]   ;;  %s6344_s12 = inlined_call_operand.vmem [shape: f32[2,1,32], index: 12, kind: input, shape index: {}]   ;;  %s6345_s13 = inlined_call_operand.vmem [shape: f32[2,1], index: 13, kind: input, shape index: {}]   ;;  %s6346_s14 = inlined_call_operand.vmem [shape: f32[2,1,32], index: 14, kind: input, shape index: {}]   ;;  %s6347_s15 = inlined_call_operand.vmem [shape: f32[2,1,32], index: 15, kind: input, shape index: {}]   ;;  %s6348_s16 = inlined_call_operand.vmem [shape: f32[2,32,128], index: 16, kind: input, shape index: {}]   ;;  %s6349_s17 = inlined_call_operand.vmem [shape: f32[2,1,128], index: 17, kind: input, shape index: {}]   ;;  %s6350_s18 = inlined_call_operand.vmem [shape: f32[2,128,32], index: 18, kind: input, shape index: {}]   ;;  %s6351_s19 = inlined_call_operand.vmem [shape: f32[2,1,32], index: 19, kind: input, shape index: {}]   ;;  %s6352_s20 = inlined_call_operand.vmem [shape: f32[2,1,32], index: 20, kind: input, shape index: {}]   ;;  %s6353_s21 = inlined_call_operand.vmem [shape: f32[2,1,32], index: 21, kind: input, shape index: {}]   ;;  %s6354_s22 = inlined_call_operand.vmem [shape: f32[1,32], index: 22, kind: input, shape index: {}]   ;;  %s6355_s23 = inlined_call_operand.vmem [shape: f32[1,32], index: 23, kind: input, shape index: {}]   ;;  %s6356_s24 = inlined_call_operand.vmem [shape: f32[32,128], index: 24, kind: input, shape index: {}]   ;;  %s6357_s25 = inlined_call_operand.hbm [shape: f32[2,16,128], index: 25, kind: output, shape index: {}]  }
   0x1   :  { %6390 = sst [smem:[#allocation13_spill]] %s6332_s0 }
   0x2   :  { %6391 = sst [smem:[#allocation14_spill]] %s6333_s1 }
   0x3   :  { %6392 = sst [smem:[#allocation15_spill]] %s6334_s2 }
   0x4   :  { %6393 = sst [smem:[#allocation16_spill]] %s6335_s3 }
   0x5   :  { %6394 = sst [smem:[#allocation17_spill]] %s6336_s4 }
   0x6   :  { %6395 = sst [smem:[#allocation18_spill]] %s6337_s5 }
   0x7   :  { %6396 = sst [smem:[#allocation19_spill]] %s6338_s6 }
   0x8   :  { %6397 = sst [smem:[#allocation20_spill]] %s6339_s7 }
   0x9   :  { %6398 = sst [smem:[#allocation21_spill]] %s6340_s8 }
   0xa   :  { %6399 = sst [smem:[#allocation22_spill]] %s6341_s9 }
   0xb   :  { %6400 = sst [smem:[#allocation23_spill]] %s6355_s23 }
   0xc   :  { %6401 = sst [smem:[#allocation24_spill]] %s6357_s25 }
   0xd   :  { %30 = vsyncpa [#allocation3], 0 }
   0xe   :  { %32 = vsyncpa [#allocation3 + $0x1], 0  ;;  %s5479_s29 = smov 0   ;;  %s5481_s2 = smov 0  }
   0xf   :  { %s5483_s6 = smov 0   ;;  %s5485_s30 = smov 0  }
  0x10 LB: > { %6402 = sst [smem:[#allocation5_spill]] %s5328_s29  ;;  %s5500_s7 = sadd.s32 4294967295, %s5340_s30   ;;  %s5340_s30 = sphi %s5485_s30, %s6436_s30   ;;  %s5336_s6 = sphi %s5483_s6, %s6438_s6   ;;  %s5332_s2 = sphi %s5481_s2, %s6440_s2   ;;  %s5328_s29 = sphi %s5479_s29, %s6439_s29  }
  0x11   : > { %6403 = sst [smem:[#allocation6_spill]] %s5336_s6  ;;  %s4017_s3 = sadd.s32 4294967294, %s5340_s30  }
  0x12   : > { %6404 = sst [smem:[#allocation7_spill]] %s5340_s30  ;;  %s5504_s26 = sadd.s32 1, %s5340_s30  }
  0x13   : > { %6405 = sst [smem:[#allocation8_spill]] %s5500_s7  ;;  %s575_s1 = sadd.s32 1, %s5336_s6 }
  0x14   : > { %6406 = sst [smem:[#allocation9_spill]] %s5504_s26  ;;  %s572_s8 = ssub.s32 %s5340_s30, %s5504_s26 }
  0x15   : > { %p585_p0 = scmp.ne.s32.totalorder %s5336_s6, %s5332_s2  ;;  %p573_p1 = scmp.eq.s32.totalorder %s572_s8, 0 }
  0x16   : > { %p586_p2 = scmp.eq.s32.totalorder %s5500_s7, 1  ;;  %p591_p3 = scmp.ne.s32.totalorder %s5332_s2, %s5328_s29 }
  0x17   : > { %p592_p4 = scmp.eq.s32.totalorder %s4017_s3, 1  ;;  %p4020_p7 = scmp.ge.s32.totalorder %s5340_s30, 1 }
  0x18   : > { %s5515_s27 = scalar_select %p573_p1, %s5336_s6, %s575_s1  }
  0x19   : > { %p5517_p5 = por %p586_p2, %p585_p0  ;;  %p5521_p6 = por %p592_p4, %p591_p3 }
  0x1a   : > { %6407 = sst [smem:[#allocation10_spill]] %s5515_s27  ;;  %p690_p8 = scmp.lt.s32.totalorder %s5340_s30, 3 }
  0x1b   : > { %s6408_s4 = scalar_select %p5517_p5, 1, 0 }
  0x1c   : > { %s6410_s28 = scalar_select %p5521_p6, 1, 0 }
  0x1d   : > { %6409 = sst [smem:[#allocation11_spill]] %s6408_s4  ;;  %p691_p9 = pnand %p4020_p7, %p690_p8 }
  0x1e   : > { %6411 = sst [smem:[#allocation12_spill]] %s6410_s28  ;;  %p758_p10 = scmp.lt.s32.totalorder (!%p691_p9), %s5500_s7, 1  ;;  %vm798_vm0 = vcmask (!%p691_p9), 130048   ;;  %vm884_vm1 = vcmask (!%p691_p9), 261120   ;;  %v5342_v45 = vmov (!%p691_p9), 0   ;;  %vm1692_vm7 = vcmask (!%p691_p9), 523264  }
  0x1f   : > { %694 = sbr.rel (%p691_p9) target bundleno = 7350 (0x1cb6), region = 120  ;;  %s6412_s0 = sld [smem:[#allocation14_spill]] (!%p691_p9)  ;;  %5132 = vset.pattern.permute.xlu1 (!%p691_p9), %v5342_v45  ;;  %5153 = vset.pattern.permute.xlu0 (!%p691_p9), %v5342_v45  ;;  %v797_v46 = vld [vmem:[%s6345_s13] sm:$0x3] (!%p691_p9)  ;;  %vm5696_vm6 = vmpackc.low (!%p691_p9), %vm884_vm1, %vm884_vm1 }
  0x20   : > { %s6413_s6 = sld [smem:[#allocation13_spill]] (!%p691_p9)  ;;  %s6414_s27 = sld [smem:[#allocation15_spill]] (!%p691_p9)  ;;  %5083 = vpush (!%p691_p9), %v797_v46 }
  0x21   : > { %s6415_s5 = sld [smem:[#allocation20_spill]] (!%p691_p9)  ;;  %s6418_s30 = sld [smem:[#allocation16_spill]] (!%p691_p9) }
  0x22   : > { %s6378_s28 = smov (!%p691_p9), 32   ;;  %s6376_s8 = smov (!%p691_p9), 96  }
  0x23   : > { %s6420_s9 = sld [smem:[#allocation17_spill]] (!%p691_p9)  ;;  %s6383_s4 = smov (!%p691_p9), 64  }
  0x25   : > { %v5531_v0 = vld [vmem:[%s6412_s0] sm:$0xff] (!%p691_p9)  ;;  %v766_v4 = vld [vmem:[%s6412_s0 + $0x8] sm:$0xff] (!%p691_p9) }
  0x26   : > { %4376 = vmatprep.mubr.msk.f32.mxu0 %vm798_vm0, %v5531_v0  ;;  %s759_s3 = scalar_select %p758_p10, %s5500_s7, 1  ;;  %v5556_v13 = vld [vmem:[%s6414_s27] sm:$0xff]  ;;  %v768_v35 = vld [vmem:[%s6414_s27 + $0x8] sm:$0xff] }
  0x27   : > { %4383 = vmatprep.mubr.msk.f32.mxu1 %vm798_vm0, %v5556_v13  ;;  %v1087_v36 = vld [vmem:[%s6415_s5] sm:$0xff]  ;;  %v1088_v37 = vld [vmem:[%s6415_s5 + $0x8] sm:$0xff]  ;;  %v1089_v42 = vld [vmem:[%s6415_s5 + $0x10] sm:$0xff]  ;;  %s6419_s25 = smov %s6418_s30  ;;  %s6425_s7 = sld [smem:[#allocation21_spill]] }
  0x28   : > { %s4160_s1 = sshll.u32 %s759_s3, 4  ;;  %v4775_v41 = vpack.c.bf16 %v1088_v37, %v1087_v36  ;;  %v1090_v43 = vld [vmem:[%s6415_s5 + $0x18] sm:$0xff]  ;;  %v769_v56 = vld [vmem:[%s6418_s30] sm:$0xff]  ;;  %v770_v57 = vld [vmem:[%s6419_s25 + $0x8] sm:$0xff]  ;;  %s6424_s3 = sld [smem:[#allocation18_spill]] }
  0x29   : > { %s762_s26 = scalar_lea.vmem %s6413_s6, %s4160_s1  ;;  %v4779_v44 = vpack.c.bf16 %v1090_v43, %v1089_v42  ;;  %s6416_s6 = sld [smem:[#allocation22_spill]]  ;;  %v5600_v59 = vpack.c.bf16 %v770_v57, %v769_v56  ;;  %v5652_v37 = vld [vmem:[%s6344_s12] ss:$0 sm:$0xff] }
  0x2a   : > { %v5539_v1 = vld [vmem:[%s762_s26] sm:$0xff]  ;;  %v5541_v2 = vld [vmem:[%s762_s26 + $0x8] sm:$0xff]  ;;  %s6426_s30 = smov 32   ;;  %s6432_s1 = sld [smem:[#allocation24_spill]] }
  0x2b   : > { %v4763_v3 = vpack.c.bf16 %v5541_v2, %v5539_v1  ;;  %v5659_v43 = vld [vmem:[%s6343_s11] ss:$0 sm:$0xff] }
  0x2d   : > { %4764 = vmatprep.subr.bf16.mxu0 %v4763_v3 }
  0x2e   : > { %4766 = vmatpush3.bf16.msra.mxu0 %v4763_v3  ;;  %v771_v3 = vld [vmem:[%s6419_s25 + $0x10] sm:$0xff] }
  0x2f   : > { %s6417_s26 = smov %s6416_s6  ;;  %v1193_v53 = vld [vmem:[%s6416_s6] sm:$0xff]  ;;  %s6430_s6 = sld [smem:[#allocation23_spill]] }
  0x30   : > { %v1194_v54 = vld [vmem:[%s6417_s26 + $0x8] sm:$0xff]  ;;  %v1195_v61 = vld [vmem:[%s6417_s26 + $0x10] sm:$0xff]  ;;  %v1196_v62 = vld [vmem:[%s6417_s26 + $0x18] sm:$0xff] }
  0x31   : > { %4377 = vmatmul.mubr.msk.f32.vlgmr.msra.gmra.mrb[0].mxu0 %vm798_vm0, %v766_v4  ;;  %v4791_v55 = vpack.c.bf16 %v1194_v54, %v1193_v53  ;;  %v4795_v63 = vpack.c.bf16 %v1196_v62, %v1195_v61  ;;  %v772_v4 = vld [vmem:[%s6419_s25 + $0x18] sm:$0xff] }
  0x32   : > { %4390 = vmatprep.mubr.msk.f32.mxu0 %vm798_vm0, %v5556_v13 }
  0x51   : > { %s5084_s29 = spop %5083 }
 0x104   : > { %v4378_v5 = vpop.f32.mrb[0].mxu0 }
 0x105   : > { %v871_v6 = vpop.f32.mrb[1].mxu0  ;;  %v881_v7 = vsub.f32 %v5541_v2, %v4378_v5  ;;  %v5618_v5 = vpack.c.bf16 %v772_v4, %v771_v3 }
 0x106   : > { %v880_v8 = vsub.f32 %v5539_v1, %v871_v6 }
 0x107   : > { %v883_v11 = vmul.f32 %v881_v7, %v881_v7 }
 0x108   : > { %v882_v9 = vmul.f32 %v880_v8, %v880_v8 }
 0x109   : > { %v888_v12 = vsel %vm884_vm1, %v883_v11, 0.0 }
 0x10a   : > { %v885_v10 = vsel %vm884_vm1, %v882_v9, 0.0  ;;  %v1174_v9 = vstv %s5084_s29 }
 0x10b   : > { %886 = vadd.xlane.f32.xlu0 %v885_v10 }
 0x10f   : > { %889 = vadd.xlane.f32.xlu0 %v888_v12 }
 0x198   : > { %v887_v14 = vpop.xlane.xlu0 %886 }
 0x199   : > { %5174 = vrsqrt.f32 %v887_v14  ;;  %vm893_vm2 = vcmp.eq.f32.partialorder %v887_v14, inf  ;;  %v896_v18 = vand.u32 2147483648, %v887_v14  ;;  %vm895_vm3 = vcmp.eq.f32.partialorder %v887_v14, 0.0 }
 0x19c   : > { %v890_v15 = vpop.xlane.xlu0 %889 }
 0x19d   : > { %5176 = vrsqrt.f32 %v890_v15  ;;  %vm900_vm4 = vcmp.eq.f32.partialorder %v890_v15, inf  ;;  %v903_v24 = vand.u32 2147483648, %v890_v15  ;;  %vm902_vm5 = vcmp.eq.f32.partialorder %v890_v15, 0.0 }
 0x1a3   : > { %v5175_v16 = vpop.eup %5174 }
 0x1a4   : > { %v892_v17 = vmul.f32 %v5175_v16, %v887_v14 }
 0x1a6   : > { %v894_v19 = vsel %vm893_vm2, %v887_v14, %v892_v17 }
 0x1a7   : > { %v5177_v20 = vpop.eup %5176  ;;  %v897_v21 = vsel %vm895_vm3, %v896_v18, %v894_v19 }
 0x1a8   : > { %v899_v22 = vmul.f32 %v5177_v20, %v890_v15  ;;  %v905_v23 = vmax.f32 %v897_v21, 1e-08 }
 0x1aa   : > { %v901_v25 = vsel %vm900_vm4, %v890_v15, %v899_v22  ;;  %5178 = vrcp.f32 %v905_v23 }
 0x1ab   : > { %v904_v26 = vsel %vm902_vm5, %v903_v24, %v901_v25  ;;  %5180 = vtanh.f32 %v897_v21 }
 0x1ac   : > { %v906_v27 = vmax.f32 %v904_v26, 1e-08  ;;  %5182 = vtanh.f32 %v904_v26 }
 0x1ae   : > { %5184 = vrcp.f32 %v906_v27  ;;  %v4032_v27 = vld [vmem:[%s6342_s10] ss:$0 sm:$0xff] }
 0x1b4   : > { %v5179_v28 = vpop.eup %5178 }
 0x1b5   : > { %v5181_v29 = vpop.eup %5180  ;;  %v908_v32 = vmul.f32 %v5179_v28, %v880_v8 }
 0x1b6   : > { %v5183_v30 = vpop.eup %5182 }
 0x1b7   : > { %v4767_v31 = vpack.c.bf16 %v5183_v30, %v5181_v29  ;;  %v996_v38 = vmul.f32 %v5181_v29, %v908_v32 }
 0x1b8   : > { %v5185_v33 = vpop.eup %5184 }
 0x1b9   : > { %4768 = vmatprep.subr.bf16.mxu1 %v4767_v31  ;;  %v910_v34 = vmul.f32 %v5185_v33, %v881_v7 }
 0x1ba   : > { %4770 = vmatpush3.bf16.msra.mxu1 %v4767_v31 }
 0x1bb   : > { %v997_v39 = vmul.f32 %v5183_v30, %v910_v34  ;;  %4792 = vmatprep.subr.bf16.mxu1 %v4791_v55 }
 0x1bd   : > { %4384 = vmatmul.mubr.msk.f32.vlgmr.msra.gmra.mrb[0].mxu1 %vm798_vm0, %v768_v35  ;;  %v4771_v40 = vpack.c.bf16 %v997_v39, %v996_v38 }
 0x1be   : > { %4794 = vmatpush3.bf16.msra.mxu1 %v4791_v55 }
 0x1bf   : > { %4772 = vmatprep.subr.bf16.mxu0 %v4771_v40  ;;  %4796 = vmatprep.subr.bf16.mxu1 %v4795_v63 }
 0x1c0   : > { %4774 = vmatpush3.bf16.msra.mxu0 %v4771_v40 }
 0x1c1   : > { %4776 = vmatprep.subr.bf16.mxu0 %v4775_v41 }
 0x1c2   : > { %4798 = vmatpush3.bf16.msra.mxu1 %v4795_v63 }
 0x1c3   : > { %4391 = vmatmul.mubr.msk.f32.vlgmr.msra.gmra.mrb[2].mxu0 %vm798_vm0, %v768_v35  ;;  %4808 = vmatprep.subr.bf16.mxu1 %v4791_v55 }
 0x1c4   : > { %4778 = vmatpush3.bf16.msra.mxu0 %v4775_v41  ;;  %4401 = vmatprep.mubr.msk.f32.mxu0 %vm884_vm1, %v5539_v1 }
 0x1c5   : > { %4780 = vmatprep.subr.bf16.mxu0 %v4779_v44 }
 0x1c8   : > { %4782 = vmatpush3.bf16.msra.mxu0 %v4779_v44 }
 0x1c9   : > { %4784 = vmatprep.subr.bf16.mxu0 %v5600_v59 }
 0x1cb   : > { %4402 = vmatmul.mubr.msk.f32.vlgmr.msra.gmra.mrb[4].mxu0 %vm884_vm1, %v5541_v2 }
 0x1cc   : > { %4786 = vmatpush3.bf16.msra.mxu0 %v5600_v59 }
 0x1cd   : > { %4788 = vmatprep.subr.bf16.mxu0 %v5618_v5 }
 0x1d0   : > { %4790 = vmatpush3.bf16.msra.mxu0 %v5618_v5 }
 0x1d1   : > { %4800 = vmatprep.subr.bf16.mxu0 %v5600_v59 }
 0x290   : > { %v4385_v47 = vpop.f32.mrb[0].mxu1 }
 0x291   : > { %v985_v48 = vpop.f32.mrb[1].mxu1  ;;  %v995_v50 = vmax.f32 %v4385_v47, 1e-08 }
 0x292   : > { %v994_v49 = vmax.f32 %v985_v48, 1e-08 }
 0x294   : > { %1075 = vperm.xlu1 %5132, %v994_v49  }
 0x296   : > { %v4392_v51 = vpop.f32.mrb[2].mxu0 }
 0x297   : > { %v1064_v52 = vpop.f32.mrb[3].mxu0 }
 0x298   : > { %1080 = vperm.xlu1 %5132, %v995_v50  }
 0x29e   : > { %v5598_v58 = vpop.f32.mrb[4].mxu0 }
 0x29f   : > { %v5602_v60 = vpop.f32.mrb[5].mxu0 }
 0x313   : > { %v1076_v6 = vpop.permute.xlu1 %1075 }
 0x314   : > { %5186 = vrcp.f32 %v1076_v6 }
 0x317   : > { %v1081_v7 = vpop.permute.xlu1 %1080 }
 0x318   : > { %5188 = vrcp.f32 %v1081_v7  ;;  %v773_v7 = vld [vmem:[%s6420_s9] sm:$0xff] }
 0x31e   : > { %v5187_v8 = vpop.eup %5186 }
 0x31f   : > { %v1084_v10 = vmul.f32 %v5187_v8, %v1064_v52  ;;  %v774_v8 = vld [vmem:[%s6420_s9 + $0x8] sm:$0xff] }
 0x321   : > { %v1176_v11 = vmul.f32 %v1174_v9, %v1084_v10  ;;  %v776_v10 = vld [vmem:[%s6420_s9 + $0x18] sm:$0xff] }
 0x322   : > { %v5189_v12 = vpop.eup %5188 }
 0x323   : > { %v1086_v14 = vmul.f32 %v5189_v12, %v4392_v51  ;;  %1182 = vrot.lane.b32.xlu0 %v1176_v11, %s6378_s28  ;;  %v1178_v15 = vadd.f32 %v1176_v11, %v5602_v60  ;;  %v778_v11 = vld [vmem:[%s6420_s9 + $0x28] sm:$0xff]  ;;  %v780_v12 = vld [vmem:[%s6420_s9 + $0x38] sm:$0xff] }
 0x325   : > { %v1177_v16 = vmul.f32 %v1174_v9, %v1086_v14  ;;  %4423 = vmatprep.mubr.msk.f32.mxu1 %vm884_vm1, %v1178_v15  ;;  %v1197_v17 = vmul.f32 %v1178_v15, %v1178_v15 }
 0x327   : > { %v1179_v18 = vadd.f32 %v5598_v58, %v1177_v16  ;;  %1184 = vrot.lane.b32.xlu1 %v1177_v16, %s6378_s28  ;;  %4412 = vmatprep.mubr.msk.f32.mxu0 %vm884_vm1, %v1197_v17  ;;  %v775_v16 = vld [vmem:[%s6420_s9 + $0x10] sm:$0xff]  ;;  %v777_v17 = vld [vmem:[%s6420_s9 + $0x20] sm:$0xff]  ;;  %s6429_s28 = sld [smem:[#allocation8_spill]] }
 0x329   : > { %4424 = vmatmul.mubr.msk.f32.vlgmr.msra.gmra.mrb[2].mxu1 %vm884_vm1, %v1179_v18  ;;  %v1198_v19 = vmul.f32 %v1179_v18, %v1179_v18  ;;  %v779_v18 = vld [vmem:[%s6420_s9 + $0x30] sm:$0xff] }
 0x32a   : > { %4810 = vmatpush3.bf16.msra.mxu1 %v4791_v55 }
 0x32b   : > { %4413 = vmatmul.mubr.msk.f32.vlgmr.msra.gmra.mrb[6].mxu0 %vm884_vm1, %v1198_v19  ;;  %4812 = vmatprep.subr.bf16.mxu1 %v4795_v63 }
 0x32c   : > { %4802 = vmatpush3.bf16.msra.mxu0 %v5600_v59 }
 0x32d   : > { %4804 = vmatprep.subr.bf16.mxu0 %v5618_v5 }
 0x32e   : > { %4814 = vmatpush3.bf16.msra.mxu1 %v4795_v63 }
 0x330   : > { %4806 = vmatpush3.bf16.msra.mxu0 %v5618_v5 }
 0x395   : > { %v1183_v20 = vpop.permute.xlu0 %1182 }
 0x396   : > { %v1188_v21 = vadd.f32 %v1183_v20, %v5602_v60 }
 0x398   : > { %1460 = vrot.lane.b32.xlu1 %v1188_v21, %s6376_s8  ;;  %v1371_v25 = vmul.f32 %v1188_v21, %v1188_v21 }
 0x399   : > { %v1185_v22 = vpop.permute.xlu1 %1184 }
 0x39a   : > { %v1189_v23 = vadd.f32 %v5598_v58, %v1185_v22 }
 0x39c   : > { %v1372_v24 = vmul.f32 %v1189_v23, %v1189_v23 }
 0x39e   : > { %1377 = vrot.lane.b32.xlu1 %v1372_v24, %s6376_s8 }
 0x3a2   : > { %1375 = vrot.lane.b32.xlu1 %v1371_v25, %s6376_s8 }
 0x3a6   : > { %1462 = vrot.lane.b32.xlu1 %v1189_v23, %s6376_s8  ;;  %s6423_s8 = sld [smem:[#allocation19_spill]] }
 0x3fc   : > { %v4425_v26 = vpop.f32.mrb[2].mxu1 }
 0x3fd   : > { %v1358_v28 = vpop.f32.mrb[3].mxu1  ;;  %v5643_v30 = vmul.f32 2.0, %v4425_v26 }
 0x3fe   : > { %v4414_v29 = vpop.f32.mrb[6].mxu0  ;;  %v1367_v33 = vmul.f32 2.0, %v1358_v28 }
 0x3ff   : > { %v5645_v31 = vadd.f32 %v4414_v29, %v4032_v27  ;;  %v1277_v32 = vpop.f32.mrb[7].mxu0 }
 0x400   : > { %v1278_v34 = vadd.f32 %v4032_v27, %v1277_v32 }
 0x401   : > { %v1370_v35 = vsub.f32 %v5645_v31, %v5643_v30 }
 0x402   : > { %v1369_v36 = vsub.f32 %v1278_v34, %v1367_v33 }
 0x404   : > { %v1547_v38 = vmul.f32 -0.5, %v1369_v36  ;;  %v1548_v36 = vmul.f32 -0.5, %v1370_v35 }
 0x406   : > { %v1555_v39 = vmul.f32 %v5652_v37, %v1547_v38  ;;  %v1556_v38 = vmul.f32 %v5652_v37, %v1548_v36 }
 0x408   : > { %v1557_v40 = vmul.f32 1.442695, %v1555_v39  ;;  %v1559_v39 = vmul.f32 1.442695, %v1556_v38 }
 0x40a   : > { %5190 = vpow2.f32 %v1557_v40  ;;  %v1461_v41 = vpop.permute.xlu1 %1460 }
 0x40b   : > { %4445 = vmatprep.mubr.msk.f32.mxu1 %vm884_vm1, %v1461_v41 }
 0x410   : > { %v1378_v42 = vpop.permute.xlu1 %1377 }
 0x414   : > { %v5191_v44 = vpop.eup %5190  ;;  %v1376_v45 = vpop.permute.xlu1 %1375 }
 0x415   : > { %4434 = vmatprep.mubr.msk.f32.mxu0 %vm884_vm1, %v1376_v45  ;;  %v1567_v46 = vmul.f32 %v5191_v44, %v5659_v43  ;;  %v790_v44 = vld [vmem:[%s6423_s8 + $0x8] sm:$0xff] }
 0x416   : > { %4435 = vmatmul.mubr.msk.f32.vlgmr.msra.gmra.mrb[8].mxu0 %vm884_vm1, %v1378_v42  ;;  %v789_v42 = vld [vmem:[%s6423_s8] sm:$0xff]  ;;  %v782_v45 = vld [vmem:[%s6424_s3 + $0x8] sm:$0xff] }
 0x417   : > { %4464 = vmatprep.mubr.msk.f32.mxu0 %vm884_vm1, %v1567_v46  ;;  %v791_v46 = vld [vmem:[%s6423_s8 + $0x10] sm:$0xff] }
 0x418   : > { %v1463_v47 = vpop.permute.xlu1 %1462 }
 0x419   : > { %4446 = vmatmul.mubr.msk.f32.vlgmr.msra.gmra.mrb[4].mxu1 %vm884_vm1, %v1463_v47  ;;  %v792_v47 = vld [vmem:[%s6423_s8 + $0x18] sm:$0xff] }
 0x4e9   : > { %v4436_v48 = vpop.f32.mrb[8].mxu0 }
 0x4ea   : > { %v1449_v49 = vpop.f32.mrb[9].mxu0  ;;  %v1455_v51 = vadd.f32 %v4436_v48, %v4032_v27  ;;  %v5743_v48 = vpack.c.bf16 %v792_v47, %v791_v46 }
 0x4eb   : > { %v1450_v54 = vadd.f32 %v4032_v27, %v1449_v49  ;;  %v781_v49 = vld [vmem:[%s6424_s3] sm:$0xff] }
 0x4ec   : > { %v4447_v50 = vpop.f32.mrb[4].mxu1 }
 0x4ed   : > { %v1544_v52 = vmul.f32 2.0, %v4447_v50  ;;  %v1534_v53 = vpop.f32.mrb[5].mxu1  ;;  %v783_v50 = vld [vmem:[%s6424_s3 + $0x10] sm:$0xff] }
 0x4ee   : > { %v1543_v55 = vmul.f32 2.0, %v1534_v53 }
 0x4ef   : > { %v1546_v56 = vsub.f32 %v1455_v51, %v1544_v52  ;;  %v793_v51 = vld [vmem:[%s6423_s8 + $0x20] sm:$0xff]  ;;  %v794_v52 = vld [vmem:[%s6423_s8 + $0x28] sm:$0xff] }
 0x4f0   : > { %v1545_v57 = vsub.f32 %v1450_v54, %v1543_v55  ;;  %v5760_v53 = vpack.c.bf16 %v794_v52, %v793_v51  ;;  %v784_v54 = vld [vmem:[%s6424_s3 + $0x18] sm:$0xff]  ;;  %v785_v55 = vld [vmem:[%s6424_s3 + $0x20] sm:$0xff] }
 0x4f1   : > { %v1570_v61 = vmul.f32 -0.5, %v1546_v56  ;;  %v795_v56 = vld [vmem:[%s6423_s8 + $0x30] sm:$0xff] }
 0x4f2   : > { %v1569_v62 = vmul.f32 -0.5, %v1545_v57  ;;  %v796_v57 = vld [vmem:[%s6423_s8 + $0x38] sm:$0xff] }
 0x4f3   : > { %v1572_v63 = vmul.f32 %v5652_v37, %v1570_v61  ;;  %v5778_v61 = vpack.c.bf16 %v796_v57, %v795_v56 }
 0x4f4   : > { %v1571_v3 = vmul.f32 %v5652_v37, %v1569_v62  ;;  %v786_v62 = vld [vmem:[%s6424_s3 + $0x28] sm:$0xff] }
 0x4f5   : > { %v1575_v4 = vmul.f32 1.442695, %v1572_v63  ;;  %v787_v63 = vld [vmem:[%s6424_s3 + $0x30] sm:$0xff] }
 0x4f6   : > { %v1573_v6 = vmul.f32 1.442695, %v1571_v3  ;;  %v788_v3 = vld [vmem:[%s6424_s3 + $0x38] sm:$0xff]  ;;  %s6427_s3 = smov 96  }
 0x4f7   : > { %5192 = vpow2.f32 %v1575_v4 }
 0x4f8   : > { %5194 = vpow2.f32 %v1573_v6 }
 0x4f9   : > { %5196 = vpow2.f32 %v1559_v39  ;;  %v1943_v39 = vld [vmem:[%s6425_s7] sm:$0xff] }
 0x501   : > { %v5193_v9 = vpop.eup %5192 }
 0x502   : > { %v5195_v14 = vpop.eup %5194  ;;  %v1578_v15 = vmul.f32 %v5193_v9, %v5659_v43 }
 0x503   : > { %v1577_v19 = vmul.f32 %v5195_v14, %v5659_v43  ;;  %v5197_v30 = vpop.eup %5196 }
 0x504   : > { %v1580_v20 = vmul.f32 %v1578_v15, %v774_v8  ;;  %v1582_v21 = vmul.f32 %v1578_v15, %v776_v10  ;;  %v1584_v22 = vmul.f32 %v1578_v15, %v778_v11  ;;  %v1586_v23 = vmul.f32 %v1578_v15, %v780_v12 }
 0x505   : > { %v1579_v24 = vmul.f32 %v1577_v19, %v773_v7  ;;  %v1581_v25 = vmul.f32 %v1577_v19, %v775_v16  ;;  %v1583_v26 = vmul.f32 %v1577_v19, %v777_v17  ;;  %v1585_v27 = vmul.f32 %v1577_v19, %v779_v18 }
 0x506   : > { %v1568_v31 = vmul.f32 %v5197_v30, %v5659_v43  ;;  %v5730_v43 = vpack.c.bf16 %v790_v44, %v789_v42  ;;  %v1945_v30 = vld [vmem:[%s6425_s7 + $0x10] sm:$0xff] }
 0x507   : > { %v4815_v29 = vpack.c.bf16 %v1580_v20, %v1579_v24  ;;  %v4821_v32 = vpack.c.bf16 %v1582_v21, %v1581_v25  ;;  %v4827_v33 = vpack.c.bf16 %v1584_v22, %v1583_v26  ;;  %v4833_v34 = vpack.c.bf16 %v1586_v23, %v1585_v27 }
 0x508   : > { %4840 = vmatprep.subr.bf16.mxu1 %v5730_v43 }
 0x509   : > { %4817 = vmatprep.subr.msk.bf16.mxu0 %vm5696_vm6, %v4815_v29  ;;  %4842 = vmatpush3.bf16.msra.mxu1 %v5730_v43 }
 0x50a   : > { %4820 = vmatpush3.bf16.xpose.msk.msra.mxu0 %vm5696_vm6, %v4815_v29  ;;  %4844 = vmatprep.subr.bf16.mxu1 %v5743_v48 }
 0x50b   : > { %4823 = vmatprep.subr.msk.bf16.mxu0 %vm5696_vm6, %v4821_v32 }
 0x50d   : > { %4846 = vmatpush3.bf16.msra.mxu1 %v5743_v48 }
 0x50e   : > { %4848 = vmatprep.subr.bf16.mxu1 %v5760_v53 }
 0x511   : > { %4850 = vmatpush3.bf16.msra.mxu1 %v5760_v53 }
 0x512   : > { %4826 = vmatpush3.bf16.xpose.msk.msra.mxu0 %vm5696_vm6, %v4821_v32  ;;  %4852 = vmatprep.subr.bf16.mxu1 %v5778_v61 }
 0x513   : > { %4829 = vmatprep.subr.msk.bf16.mxu0 %vm5696_vm6, %v4827_v33 }
 0x515   : > { %4854 = vmatpush3.bf16.msra.mxu1 %v5778_v61 }
 0x51a   : > { %4832 = vmatpush3.bf16.xpose.msk.msra.mxu0 %vm5696_vm6, %v4827_v33 }
 0x51b   : > { %4835 = vmatprep.subr.msk.bf16.mxu0 %vm5696_vm6, %v4833_v34 }
 0x522   : > { %4838 = vmatpush3.bf16.xpose.msk.msra.mxu0 %vm5696_vm6, %v4833_v34 }
 0x529   : > { %4465 = vmatmul.mubr.msk.f32.vlgmr.msra.gmra.mrb[10].mxu0 %vm884_vm1, %v1568_v31  ;;  %v1946_v31 = vld [vmem:[%s6425_s7 + $0x18] sm:$0xff] }
 0x5fc   : > { %v4466_v35 = vpop.f32.mrb[10].mxu0 }
 0x5fd   : > { %v1683_v37 = vpop.f32.mrb[11].mxu0  ;;  %v1696_v40 = vsel %vm1692_vm7, %v4466_v35, -inf }
 0x5fe   : > { %1697 = vmax.xlane.f32.xlu0 %v1696_v40  ;;  %v1693_v41 = vsel %vm1692_vm7, %v1683_v37, -inf }
 0x5ff   : > { %1694 = vmax.xlane.f32.xlu1 %v1693_v41 }
 0x610   : > { %1800 = vrot.lane.b32.xlu1 %v782_v45, %s6383_s4 }
 0x614   : > { %1798 = vrot.lane.b32.xlu0 %v781_v49, %s6383_s4  ;;  %1802 = vrot.lane.b32.xlu1 %v783_v50, %s6383_s4 }
 0x618   : > { %1804 = vrot.lane.b32.xlu0 %v784_v54, %s6383_s4  ;;  %1806 = vrot.lane.b32.xlu1 %v785_v55, %s6383_s4 }
 0x61c   : > { %1808 = vrot.lane.b32.xlu0 %v786_v62, %s6383_s4  ;;  %1810 = vrot.lane.b32.xlu1 %v787_v63, %s6383_s4 }
 0x620   : > { %1812 = vrot.lane.b32.xlu0 %v788_v3, %s6383_s4 }
 0x68b   : > { %v1698_v4 = vpop.xlane.xlu0 %1697 }
 0x68c   : > { %v1700_v6 = vsub.f32 %v4466_v35, %v1698_v4  ;;  %v1695_v7 = vpop.xlane.xlu1 %1694  ;;  %v4875_v35 = vpack.c.bf16 %v1946_v31, %v1945_v30  ;;  %v2077_v30 = vld [vmem:[%s6348_s16 + $0x10] sm:$0xff] }
 0x68d   : > { %v1699_v8 = vsub.f32 %v1683_v37, %v1695_v7 }
 0x68e   : > { %v1703_v9 = vmul.f32 1.442695, %v1700_v6 }
 0x68f   : > { %v1701_v10 = vmul.f32 1.442695, %v1699_v8  ;;  %v5796_v11 = vpop.permute.xlu0 %1798 }
 0x690   : > { %v1822_v12 = vmul.f32 %v5796_v11, %v5602_v60  ;;  %v5800_v14 = vpop.permute.xlu1 %1800 }
 0x691   : > { %5198 = vpow2.f32 %v1701_v10  ;;  %v1823_v15 = vmul.f32 %v5598_v58, %v5800_v14 }
 0x692   : > { %5200 = vpow2.f32 %v1703_v9 }
 0x693   : > { %v5133_v16 = vpack.i.bf16 %v1823_v15, %v1822_v12  ;;  %v5804_v17 = vpop.permute.xlu0 %1804 }
 0x694   : > { %v1825_v18 = vmul.f32 %v5598_v58, %v5804_v17  ;;  %v5808_v19 = vpop.permute.xlu1 %1802 }
 0x695   : > { %v1824_v20 = vmul.f32 %v5808_v19, %v5602_v60  ;;  %5134 = vrot.lane.b32.xlu1 %v5133_v16, %s6383_s4 }
 0x697   : > { %v5138_v21 = vpack.i.bf16 %v1825_v18, %v1824_v20  ;;  %v5813_v22 = vpop.permute.xlu0 %1808 }
 0x698   : > { %v1827_v23 = vmul.f32 %v5598_v58, %v5813_v22  ;;  %v5817_v24 = vpop.permute.xlu1 %1806 }
 0x699   : > { %v1826_v25 = vmul.f32 %v5817_v24, %v5602_v60  ;;  %5139 = vrot.lane.b32.xlu0 %v5138_v21, %s6383_s4 }
 0x69b   : > { %v5199_v26 = vpop.eup %5198  ;;  %v5143_v27 = vpack.i.bf16 %v1827_v23, %v1826_v25  ;;  %v5822_v29 = vpop.permute.xlu0 %1812 }
 0x69c   : > { %v5201_v32 = vpop.eup %5200  ;;  %v1829_v33 = vmul.f32 %v5598_v58, %v5822_v29  ;;  %4483 = vmatprep.mubr.msk.f32.mxu1 %vm1692_vm7, %v5199_v26  ;;  %v5827_v34 = vpop.permute.xlu1 %1810  ;;  %v1944_v58 = vld [vmem:[%s6425_s7 + $0x8] sm:$0xff] }
 0x69d   : > { %v1828_v36 = vmul.f32 %v5827_v34, %v5602_v60  ;;  %4484 = vmatmul.mubr.msk.f32.vlgmr.msra.gmra.mrb[6].mxu1 %vm1692_vm7, %v5201_v32  ;;  %5144 = vrot.lane.b32.xlu1 %v5143_v27, %s6383_s4  ;;  %v4871_v60 = vpack.c.bf16 %v1944_v58, %v1943_v39  ;;  %v2076_v39 = vld [vmem:[%s6348_s16 + $0x8] sm:$0xff] }
 0x69f   : > { %v5148_v38 = vpack.i.bf16 %v1829_v33, %v1828_v36  ;;  %4872 = vmatprep.subr.bf16.mxu0 %v4871_v60 }
 0x6a0   : > { %4874 = vmatpush3.bf16.msra.mxu0 %v4871_v60  ;;  %v2078_v60 = vld [vmem:[%s6348_s16 + $0x18] sm:$0xff] }
 0x6a1   : > { %5149 = vrot.lane.b32.xlu0 %v5148_v38, %s6383_s4  ;;  %4876 = vmatprep.subr.bf16.mxu0 %v4875_v35  ;;  %v4883_v31 = vpack.c.bf16 %v2078_v60, %v2077_v30  ;;  %s6428_s4 = smov 64  }
 0x6a4   : > { %4878 = vmatpush3.bf16.msra.mxu0 %v4875_v35  ;;  %v2177_v35 = vld [vmem:[%s6350_s18] sm:$0xff] }
 0x707   : > { %v5135_v37 = vpop.permute.xlu1 %5134 }
 0x708   : > { %v5137_v40 = vunpack.i.h.bf16 %v5135_v37  ;;  %v5136_v41 = vunpack.i.l.bf16 %v5135_v37  ;;  %v2178_v37 = vld [vmem:[%s6350_s18 + $0x8] sm:$0xff] }
 0x70a   : > { %v4855_v42 = vpack.c.bf16 %v5137_v40, %v5136_v41  ;;  %v2179_v40 = vld [vmem:[%s6350_s18 + $0x10] sm:$0xff]  ;;  %v4887_v41 = vpack.c.bf16 %v2178_v37, %v2177_v35 }
 0x70b   : > { %v5140_v44 = vpop.permute.xlu0 %5139 }
 0x70c   : > { %v5142_v45 = vunpack.i.h.bf16 %v5140_v44  ;;  %v5141_v46 = vunpack.i.l.bf16 %v5140_v44  ;;  %4856 = vmatprep.subr.bf16.mxu1 %v4855_v42  ;;  %4888 = vmatprep.subr.bf16.mxu0 %v4887_v41 }
 0x70d   : > { %4858 = vmatpush3.bf16.msra.mxu1 %v4855_v42  ;;  %v2180_v42 = vld [vmem:[%s6350_s18 + $0x18] sm:$0xff] }
 0x70e   : > { %v4859_v47 = vpack.c.bf16 %v5142_v45, %v5141_v46  ;;  %v4891_v44 = vpack.c.bf16 %v2180_v42, %v2179_v40  ;;  %v2181_v45 = vld [vmem:[%s6350_s18 + $0x20] sm:$0xff]  ;;  %v2182_v46 = vld [vmem:[%s6350_s18 + $0x28] sm:$0xff] }
 0x70f   : > { %v5145_v49 = vpop.permute.xlu1 %5144 }
 0x710   : > { %v5147_v50 = vunpack.i.h.bf16 %v5145_v49  ;;  %v5146_v51 = vunpack.i.l.bf16 %v5145_v49  ;;  %4860 = vmatprep.subr.bf16.mxu1 %v4859_v47 }
 0x711   : > { %4862 = vmatpush3.bf16.msra.mxu1 %v4859_v47  ;;  %v4895_v47 = vpack.c.bf16 %v2182_v46, %v2181_v45  ;;  %v4064_v46 = vld [vmem:[%s6351_s19] ss:$0 sm:$0xff] }
 0x712   : > { %v4863_v52 = vpack.c.bf16 %v5147_v50, %v5146_v51 }
 0x713   : > { %v5150_v54 = vpop.permute.xlu0 %5149 }
 0x714   : > { %v5152_v55 = vunpack.i.h.bf16 %v5150_v54  ;;  %v5151_v56 = vunpack.i.l.bf16 %v5150_v54  ;;  %4864 = vmatprep.subr.bf16.mxu1 %v4863_v52 }
 0x715   : > { %4866 = vmatpush3.bf16.msra.mxu1 %v4863_v52 }
 0x716   : > { %v4867_v57 = vpack.c.bf16 %v5152_v55, %v5151_v56 }
 0x718   : > { %4868 = vmatprep.subr.bf16.mxu1 %v4867_v57 }
 0x719   : > { %4870 = vmatpush3.bf16.msra.mxu1 %v4867_v57  ;;  %v4059_v57 = vld [vmem:[%s6346_s14] ss:$0 sm:$0xff] }
 0x770   : > { %v4485_v62 = vpop.f32.mrb[6].mxu1 }
 0x771   : > { %5202 = vrcp.f32 %v4485_v62  ;;  %v1777_v63 = vpop.f32.mrb[7].mxu1 }
 0x772   : > { %5204 = vrcp.f32 %v1777_v63 }
 0x77b   : > { %v5203_v3 = vpop.eup %5202 }
 0x77c   : > { %v5205_v4 = vpop.eup %5204  ;;  %v1789_v7 = vmul.f32 %v5203_v3, %v5201_v32 }
 0x77d   : > { %v1787_v6 = vmul.f32 %v5205_v4, %v5199_v26  ;;  %v4060_v4 = vld [vmem:[%s6347_s15] ss:$0 sm:$0xff] }
 0x77f   : > { %4502 = vmatprep.mubr.msk.f32.mxu1 %vm1692_vm7, %v1787_v6 }
 0x780   : > { %4503 = vmatmul.mubr.msk.f32.vlgmr.msra.gmra.mrb[8].mxu1 %vm1692_vm7, %v1789_v7 }
 0x853   : > { %v4504_v8 = vpop.f32.mrb[8].mxu1 }
 0x854   : > { %v1934_v9 = vpop.f32.mrb[9].mxu1 }
 0x855   : > { %4513 = vmatprep.mubr.msk.f32.mxu0 %vm884_vm1, %v1934_v9 }
 0x856   : > { %4514 = vmatmul.mubr.msk.f32.vlgmr.msra.gmra.mrb[12].mxu0 %vm884_vm1, %v4504_v8 }
 0x857   : > { %4890 = vmatpush3.bf16.msra.mxu0 %v4887_v41 }
 0x858   : > { %4892 = vmatprep.subr.bf16.mxu0 %v4891_v44 }
 0x85b   : > { %4894 = vmatpush3.bf16.msra.mxu0 %v4891_v44 }
 0x85c   : > { %4896 = vmatprep.subr.bf16.mxu0 %v4895_v47 }
 0x85f   : > { %4898 = vmatpush3.bf16.msra.mxu0 %v4895_v47 }
 0x929   : > { %v4515_v10 = vpop.f32.mrb[12].mxu0 }
 0x92a   : > { %v2029_v12 = vadd.f32 %v4515_v10, %v5541_v2  ;;  %v2019_v15 = vpop.f32.mrb[13].mxu0  ;;  %v2183_v10 = vld [vmem:[%s6350_s18 + $0x30] sm:$0xff] }
 0x92b   : > { %v2028_v16 = vadd.f32 %v2019_v15, %v5539_v1  ;;  %v2075_v1 = vld [vmem:[%s6348_s16] sm:$0xff] }
 0x92c   : > { %v2035_v18 = vsel %vm884_vm1, %v2029_v12, 0.0  ;;  %v4879_v58 = vpack.c.bf16 %v2076_v39, %v2075_v1 }
 0x92d   : > { %2036 = vadd.xlane.f32.xlu0 %v2035_v18  ;;  %v2032_v20 = vsel %vm884_vm1, %v2028_v16, 0.0  ;;  %v2186_v18 = vld [vmem:[%s6350_s18 + $0x48] sm:$0xff] }
 0x92e   : > { %2033 = vadd.xlane.f32.xlu1 %v2032_v20  ;;  %4880 = vmatprep.subr.bf16.mxu1 %v4879_v58  ;;  %v2187_v20 = vld [vmem:[%s6350_s18 + $0x50] sm:$0xff] }
 0x92f   : > { %4882 = vmatpush3.bf16.msra.mxu1 %v4879_v58 }
 0x930   : > { %4884 = vmatprep.subr.bf16.mxu1 %v4883_v31 }
 0x933   : > { %4886 = vmatpush3.bf16.msra.mxu1 %v4883_v31 }
 0x9ba   : > { %v2037_v21 = vpop.xlane.xlu0 %2036 }
 0x9bb   : > { %v2040_v23 = vmul.f32 0.03125, %v2037_v21  ;;  %v2034_v25 = vpop.xlane.xlu1 %2033  ;;  %v2188_v21 = vld [vmem:[%s6350_s18 + $0x58] sm:$0xff] }
 0x9bc   : > { %v2039_v26 = vmul.f32 0.03125, %v2034_v25  ;;  %v2189_v25 = vld [vmem:[%s6350_s18 + $0x60] sm:$0xff] }
 0x9bd   : > { %v2042_v27 = vsub.f32 %v2029_v12, %v2040_v23  ;;  %v2184_v12 = vld [vmem:[%s6350_s18 + $0x38] sm:$0xff]  ;;  %v4907_v23 = vpack.c.bf16 %v2188_v21, %v2187_v20 }
 0x9be   : > { %v2041_v32 = vsub.f32 %v2028_v16, %v2039_v26  ;;  %v4899_v15 = vpack.c.bf16 %v2184_v12, %v2183_v10  ;;  %v2185_v16 = vld [vmem:[%s6350_s18 + $0x40] sm:$0xff]  ;;  %v2190_v26 = vld [vmem:[%s6350_s18 + $0x68] sm:$0xff] }
 0x9bf   : > { %v2044_v33 = vmul.f32 %v2042_v27, %v2042_v27 }
 0x9c0   : > { %v2043_v36 = vmul.f32 %v2041_v32, %v2041_v32  ;;  %4900 = vmatprep.subr.bf16.mxu0 %v4899_v15 }
 0x9c1   : > { %v2048_v38 = vsel %vm884_vm1, %v2044_v33, 0.0  ;;  %4902 = vmatpush3.bf16.msra.mxu0 %v4899_v15  ;;  %v2192_v33 = vld [vmem:[%s6350_s18 + $0x78] sm:$0xff] }
 0x9c2   : > { %2049 = vadd.xlane.f32.xlu1 %v2048_v38  ;;  %v2045_v2 = vsel %vm884_vm1, %v2043_v36, 0.0  ;;  %v4061_v38 = vld [vmem:[%s6349_s17] ss:$0 sm:$0xff] }
 0x9c3   : > { %2046 = vadd.xlane.f32.xlu0 %v2045_v2 }
 0xa4f   : > { %v2050_v49 = vpop.xlane.xlu1 %2049 }
 0xa50   : > { %v2052_v50 = vmul.f32 0.03125, %v2050_v49  ;;  %v2047_v51 = vpop.xlane.xlu0 %2046 }
 0xa51   : > { %v2051_v52 = vmul.f32 0.03125, %v2047_v51 }
 0xa52   : > { %v2054_v54 = vadd.f32 1e-05, %v2052_v50 }
 0xa53   : > { %v2053_v55 = vadd.f32 1e-05, %v2051_v52 }
 0xa54   : > { %5206 = vrsqrt.f32 %v2054_v54 }
 0xa55   : > { %5208 = vrsqrt.f32 %v2053_v55 }
 0xa5e   : > { %v5207_v56 = vpop.eup %5206 }
 0xa5f   : > { %v5209_v62 = vpop.eup %5208  ;;  %v2058_v63 = vmul.f32 %v5207_v56, %v2042_v27  ;;  %v4911_v27 = vpack.c.bf16 %v2190_v26, %v2189_v25 }
 0xa60   : > { %v2057_v3 = vmul.f32 %v5209_v62, %v2041_v32  ;;  %v2191_v32 = vld [vmem:[%s6350_s18 + $0x70] sm:$0xff] }
 0xa61   : > { %v2066_v6 = vmul.f32 %v4059_v57, %v2058_v63  ;;  %v4915_v36 = vpack.c.bf16 %v2192_v33, %v2191_v32  ;;  %v4066_v32 = vld [vmem:[%s6353_s21] ss:$0 sm:$0xff] }
 0xa62   : > { %v2065_v7 = vmul.f32 %v4059_v57, %v2057_v3 }
 0xa63   : > { %v2074_v9 = vadd.f32 %v4060_v4, %v2066_v6 }
 0xa64   : > { %v2073_v8 = vadd.f32 %v4060_v4, %v2065_v7 }
 0xa66   : > { %4524 = vmatprep.mubr.msk.f32.mxu1 %vm884_vm1, %v2073_v8 }
 0xa67   : > { %4525 = vmatmul.mubr.msk.f32.vlgmr.msra.gmra.mrb[10].mxu1 %vm884_vm1, %v2074_v9 }
 0xa68   : > { %4566 = vmatprep.mubr.msk.f32.mxu1 %vm798_vm0, %v5531_v0  ;;  %v4903_v0 = vpack.c.bf16 %v2186_v18, %v2185_v16 }
 0xa6a   : > { %4904 = vmatprep.subr.bf16.mxu0 %v4903_v0 }
 0xa6b   : > { %4906 = vmatpush3.bf16.msra.mxu0 %v4903_v0 }
 0xa6c   : > { %4908 = vmatprep.subr.bf16.mxu0 %v4907_v23 }
 0xa6f   : > { %4910 = vmatpush3.bf16.msra.mxu0 %v4907_v23  ;;  %v4065_v23 = vld [vmem:[%s6352_s20] ss:$0 sm:$0xff] }
 0xa70   : > { %4912 = vmatprep.subr.bf16.mxu0 %v4911_v27 }
 0xa73   : > { %4914 = vmatpush3.bf16.msra.mxu0 %v4911_v27 }
 0xa74   : > { %4916 = vmatprep.subr.bf16.mxu0 %v4915_v36 }
 0xa77   : > { %4918 = vmatpush3.bf16.msra.mxu0 %v4915_v36 }
 0xb3a   : > { %v4526_v2 = vpop.f32.mrb[10].mxu1 }
 0xb3b   : > { %v2164_v1 = vadd.f32 %v4526_v2, %v4061_v38  ;;  %v2158_v39 = vpop.f32.mrb[11].mxu1 }
 0xb3c   : > { %v2159_v58 = vadd.f32 %v4061_v38, %v2158_v39  ;;  %v5266_v39 = vld [vmem:[%s6412_s0 + $0x8] sm:$0xff] }
 0xb3d   : > { %v2170_v30 = vmul.f32 0.70710677, %v2164_v1  ;;  %v2168_v42 = vmul.f32 0.5, %v2164_v1 }
 0xb3e   : > { %v2169_v60 = vmul.f32 0.70710677, %v2159_v58  ;;  %v2167_v40 = vmul.f32 0.5, %v2159_v58 }
 0xb3f   : > { %5210 = verf.f32 %v2170_v30 }
 0xb40   : > { %5212 = verf.f32 %v2169_v60 }
 0xb49   : > { %v5211_v31 = vpop.eup %5210 }
 0xb4a   : > { %v5213_v35 = vpop.eup %5212  ;;  %v2174_v37 = vadd.f32 1.0, %v5211_v31 }
 0xb4b   : > { %v2173_v41 = vadd.f32 1.0, %v5213_v35 }
 0xb4c   : > { %v2176_v45 = vmul.f32 %v2174_v37, %v2168_v42 }
 0xb4d   : > { %v2175_v44 = vmul.f32 %v2173_v41, %v2167_v40 }
 0xb4f   : > { %4559 = vmatprep.mubr.f32.mxu0 %v2175_v44 }
 0xb50   : > { %4560 = vmatmul.mubr.f32.vlgmr.msra.gmra.mrb[14].mxu0 %v2176_v45 }
 0xc23   : > { %v4561_v47 = vpop.f32.mrb[14].mxu0 }
 0xc24   : > { %v2272_v49 = vadd.f32 %v4561_v47, %v4064_v46  ;;  %v2266_v50 = vpop.f32.mrb[15].mxu0 }
 0xc25   : > { %v2267_v51 = vadd.f32 %v4064_v46, %v2266_v50 }
 0xc26   : > { %v2276_v52 = vadd.f32 %v2272_v49, %v2074_v9 }
 0xc27   : > { %v2275_v54 = vadd.f32 %v2267_v51, %v2073_v8 }
 0xc28   : > { %v2282_v55 = vsel %vm884_vm1, %v2276_v52, 0.0 }
 0xc29   : > { %2283 = vadd.xlane.f32.xlu1 %v2282_v55  ;;  %v2279_v56 = vsel %vm884_vm1, %v2275_v54, 0.0 }
 0xc2a   : > { %2280 = vadd.xlane.f32.xlu0 %v2279_v56 }
 0xcb6   : > { %v2284_v57 = vpop.xlane.xlu1 %2283 }
 0xcb7   : > { %v2286_v62 = vmul.f32 0.03125, %v2284_v57  ;;  %v2281_v63 = vpop.xlane.xlu0 %2280 }
 0xcb8   : > { %v2285_v3 = vmul.f32 0.03125, %v2281_v63 }
 0xcb9   : > { %v2288_v4 = vsub.f32 %v2276_v52, %v2286_v62 }
 0xcba   : > { %v2287_v6 = vsub.f32 %v2275_v54, %v2285_v3 }
 0xcbb   : > { %v2290_v7 = vmul.f32 %v2288_v4, %v2288_v4 }
 0xcbc   : > { %v2289_v10 = vmul.f32 %v2287_v6, %v2287_v6 }
 0xcbd   : > { %v2294_v12 = vsel %vm884_vm1, %v2290_v7, 0.0 }
 0xcbe   : > { %2295 = vadd.xlane.f32.xlu1 %v2294_v12  ;;  %v2291_v9 = vsel %vm884_vm1, %v2289_v10, 0.0 }
 0xcbf   : > { %2292 = vadd.xlane.f32.xlu0 %v2291_v9  ;;  %v4073_v9 = vld [vmem:[%s6415_s5 + $0x20] sm:$0xff] }
 0xd4b   : > { %v2296_v8 = vpop.xlane.xlu1 %2295 }
 0xd4c   : > { %v2298_v15 = vmul.f32 0.03125, %v2296_v8  ;;  %v2293_v16 = vpop.xlane.xlu0 %2292  ;;  %v4074_v8 = vld [vmem:[%s6415_s5 + $0x28] sm:$0xff] }
 0xd4d   : > { %v2297_v18 = vmul.f32 0.03125, %v2293_v16  ;;  %v5267_v16 = vld [vmem:[%s6414_s27 + $0x8] sm:$0xff] }
 0xd4e   : > { %v2300_v0 = vadd.f32 1e-05, %v2298_v15 }
 0xd4f   : > { %v2299_v20 = vadd.f32 1e-05, %v2297_v18 }
 0xd50   : > { %5214 = vrsqrt.f32 %v2300_v0  ;;  %v4931_v0 = vpack.c.bf16 %v4074_v8, %v4073_v9 }
 0xd51   : > { %5216 = vrsqrt.f32 %v2299_v20  ;;  %v5268_v20 = vld [vmem:[%s6414_s27] sm:$0xff] }
 0xd5a   : > { %v5215_v21 = vpop.eup %5214 }
 0xd5b   : > { %v5217_v25 = vpop.eup %5216  ;;  %v2304_v26 = vmul.f32 %v5215_v21, %v2288_v4  ;;  %v4075_v21 = vld [vmem:[%s6415_s5 + $0x30] sm:$0xff] }
 0xd5c   : > { %v2303_v27 = vmul.f32 %v5217_v25, %v2287_v6 }
 0xd5d   : > { %v2312_v33 = vmul.f32 %v4065_v23, %v2304_v26  ;;  %v5269_v26 = vld [vmem:[%s6345_s13] sm:$0x3] }
 0xd5e   : > { %v2311_v36 = vmul.f32 %v4065_v23, %v2303_v27  ;;  %v4076_v23 = vld [vmem:[%s6415_s5 + $0x38] sm:$0xff]  ;;  %v2682_v27 = vrot.slane %v5269_v26, 1 }
 0xd5f   : > { %v5942_v38 = vadd.f32 %v4066_v32, %v2312_v33  ;;  %v4935_v25 = vpack.c.bf16 %v4076_v23, %v4075_v21 }
 0xd60   : > { %v5944_v2 = vadd.f32 %v4066_v32, %v2311_v36  ;;  %5085 = vpush %v2682_v27  ;;  %v6061_v27 = vld [vmem:[%s6344_s12 + $0x1] ss:$0 sm:$0xff] }
 0xd62   : > { %v4919_v1 = vpack.c.bf16 %v5942_v38, %v5944_v2 }
 0xd64   : > { %4920 = vmatprep.subr.bf16.mxu1 %v4919_v1 }
 0xd65   : > { %4922 = vmatpush3.bf16.msra.mxu1 %v4919_v1 }
 0xd68   : > { %4567 = vmatmul.mubr.msk.f32.vlgmr.msra.gmra.mrb[12].mxu1 %vm798_vm0, %v5266_v39 }
 0xd69   : > { %4573 = vmatprep.mubr.msk.f32.mxu1 %vm798_vm0, %v5556_v13 }
 0xd91   : > { %s5086_s23 = spop %5085 }
 0xe3b   : > { %v4568_v58 = vpop.f32.mrb[12].mxu1 }
 0xe3c   : > { %v2397_v30 = vsub.f32 %v5942_v38, %v4568_v58  ;;  %v2387_v60 = vpop.f32.mrb[13].mxu1 }
 0xe3d   : > { %v2396_v31 = vsub.f32 %v5944_v2, %v2387_v60  ;;  %v4083_v60 = vld [vmem:[%s6417_s26 + $0x28] sm:$0xff] }
 0xe3e   : > { %v2399_v35 = vmul.f32 %v2397_v30, %v2397_v30 }
 0xe3f   : > { %v2398_v37 = vmul.f32 %v2396_v31, %v2396_v31 }
 0xe40   : > { %v2403_v40 = vsel %vm884_vm1, %v2399_v35, 0.0 }
 0xe41   : > { %2404 = vadd.xlane.f32.xlu1 %v2403_v40  ;;  %v2400_v41 = vsel %vm884_vm1, %v2398_v37, 0.0  ;;  %v4084_v40 = vld [vmem:[%s6417_s26 + $0x30] sm:$0xff] }
 0xe42   : > { %2401 = vadd.xlane.f32.xlu0 %v2400_v41  ;;  %v4085_v41 = vld [vmem:[%s6417_s26 + $0x38] sm:$0xff] }
 0xece   : > { %v2405_v42 = vpop.xlane.xlu1 %2404 }
 0xecf   : > { %5218 = vrsqrt.f32 %v2405_v42  ;;  %v2402_v44 = vpop.xlane.xlu0 %2401  ;;  %vm2415_vm8 = vcmp.eq.f32.partialorder %v2405_v42, inf  ;;  %v2418_v47 = vand.u32 2147483648, %v2405_v42  ;;  %vm2417_vm9 = vcmp.eq.f32.partialorder %v2405_v42, 0.0 }
 0xed0   : > { %5220 = vrsqrt.f32 %v2402_v44  ;;  %vm2408_vm10 = vcmp.eq.f32.partialorder %v2402_v44, inf  ;;  %v2411_v51 = vand.u32 2147483648, %v2402_v44  ;;  %vm2410_vm11 = vcmp.eq.f32.partialorder %v2402_v44, 0.0 }
 0xed9   : > { %v5219_v45 = vpop.eup %5218 }
 0xeda   : > { %v5221_v13 = vpop.eup %5220  ;;  %v2414_v46 = vmul.f32 %v5219_v45, %v2405_v42 }
 0xedb   : > { %v2407_v49 = vmul.f32 %v5221_v13, %v2402_v44  ;;  %v4951_v13 = vpack.c.bf16 %v4085_v41, %v4084_v40 }
 0xedc   : > { %v2416_v50 = vsel %vm2415_vm8, %v2405_v42, %v2414_v46 }
 0xedd   : > { %v2419_v52 = vsel %vm2417_vm9, %v2418_v47, %v2416_v50  ;;  %v2409_v54 = vsel %vm2408_vm10, %v2402_v44, %v2407_v49 }
 0xede   : > { %v2421_v55 = vmax.f32 %v2419_v52, 1e-08  ;;  %v2412_v56 = vsel %vm2410_vm11, %v2411_v51, %v2409_v54  ;;  %5222 = vtanh.f32 %v2419_v52  ;;  %v2684_v51 = vstv %s5086_s23 }
 0xedf   : > { %v2420_v57 = vmax.f32 %v2412_v56, 1e-08  ;;  %5224 = vtanh.f32 %v2412_v56 }
 0xee0   : > { %5226 = vrcp.f32 %v2421_v55 }
 0xee1   : > { %5228 = vrcp.f32 %v2420_v57 }
 0xee8   : > { %v5223_v62 = vpop.eup %5222 }
 0xee9   : > { %v5225_v63 = vpop.eup %5224 }
 0xeea   : > { %v5227_v3 = vpop.eup %5226  ;;  %v4923_v4 = vpack.c.bf16 %v5223_v62, %v5225_v63 }
 0xeeb   : > { %v5229_v6 = vpop.eup %5228  ;;  %v2425_v7 = vmul.f32 %v5227_v3, %v2397_v30  ;;  %v4082_v30 = vld [vmem:[%s6417_s26 + $0x20] sm:$0xff] }
 0xeec   : > { %4924 = vmatprep.subr.bf16.mxu1 %v4923_v4  ;;  %v2423_v10 = vmul.f32 %v5229_v6, %v2396_v31  ;;  %v4947_v31 = vpack.c.bf16 %v4083_v60, %v4082_v30  ;;  %v6068_v30 = vld [vmem:[%s6343_s11 + $0x1] ss:$0 sm:$0xff] }
 0xeed   : > { %4926 = vmatpush3.bf16.msra.mxu1 %v4923_v4  ;;  %v2506_v12 = vmul.f32 %v5223_v62, %v2425_v7 }
 0xeee   : > { %v2505_v15 = vmul.f32 %v5225_v63, %v2423_v10  ;;  %4948 = vmatprep.subr.bf16.mxu0 %v4947_v31 }
 0xeef   : > { %4950 = vmatpush3.bf16.msra.mxu0 %v4947_v31 }
 0xef0   : > { %4574 = vmatmul.mubr.msk.f32.vlgmr.msra.gmra.mrb[14].mxu1 %vm798_vm0, %v5267_v16  ;;  %v4927_v18 = vpack.c.bf16 %v2506_v12, %v2505_v15  ;;  %4952 = vmatprep.subr.bf16.mxu0 %v4951_v13 }
 0xef1   : > { %4580 = vmatprep.mubr.msk.f32.mxu1 %vm798_vm0, %v5268_v20 }
 0xef2   : > { %4928 = vmatprep.subr.bf16.mxu1 %v4927_v18 }
 0xef3   : > { %4930 = vmatpush3.bf16.msra.mxu1 %v4927_v18  ;;  %4954 = vmatpush3.bf16.msra.mxu0 %v4951_v13 }
 0xef4   : > { %4932 = vmatprep.subr.bf16.mxu1 %v4931_v0  ;;  %4964 = vmatprep.subr.bf16.mxu0 %v4947_v31 }
 0xef6   : > { %4581 = vmatmul.mubr.msk.f32.vlgmr.msra.gmra.mrb[16].mxu1 %vm798_vm0, %v5267_v16 }
 0xef7   : > { %4934 = vmatpush3.bf16.msra.mxu1 %v4931_v0  ;;  %4591 = vmatprep.mubr.msk.f32.mxu1 %vm884_vm1, %v5944_v2 }
 0xef8   : > { %4936 = vmatprep.subr.bf16.mxu1 %v4935_v25 }
 0xefb   : > { %4938 = vmatpush3.bf16.msra.mxu1 %v4935_v25 }
 0xefc   : > { %4940 = vmatprep.subr.bf16.mxu1 %v5600_v59 }
 0xefe   : > { %4592 = vmatmul.mubr.msk.f32.vlgmr.msra.gmra.mrb[18].mxu1 %vm884_vm1, %v5942_v38 }
 0xeff   : > { %4942 = vmatpush3.bf16.msra.mxu1 %v5600_v59 }
 0xf00   : > { %4944 = vmatprep.subr.bf16.mxu1 %v5618_v5 }
 0xf03   : > { %4946 = vmatpush3.bf16.msra.mxu1 %v5618_v5 }
 0xf04   : > { %4956 = vmatprep.subr.bf16.mxu1 %v5600_v59 }
 0xfc3   : > { %v4575_v32 = vpop.f32.mrb[14].mxu1 }
 0xfc4   : > { %v2504_v33 = vmax.f32 %v4575_v32, 1e-08  ;;  %v2494_v36 = vpop.f32.mrb[15].mxu1 }
 0xfc5   : > { %v2503_v1 = vmax.f32 %v2494_v36, 1e-08 }
 0xfc6   : > { %2589 = vperm.xlu1 %5132, %v2504_v33  }
 0xfc7   : > { %2584 = vperm.xlu0 %5153, %v2503_v1  }
 0xfc9   : > { %v4582_v39 = vpop.f32.mrb[16].mxu1 }
 0xfca   : > { %v2573_v58 = vpop.f32.mrb[17].mxu1 }
 0xfd1   : > { %v4593_v35 = vpop.f32.mrb[18].mxu1 }
 0xfd2   : > { %v2673_v37 = vpop.f32.mrb[19].mxu1  ;;  %v6004_v42 = vmul.f32 %v4593_v35, %v5804_v17  ;;  %v6007_v44 = vmul.f32 %v4593_v35, %v5822_v29  ;;  %v6010_v45 = vmul.f32 %v4593_v35, %v5800_v14  ;;  %v6025_v17 = vmul.f32 %v4593_v35, %v5813_v22 }
 0xfd3   : > { %v6013_v46 = vmul.f32 %v2673_v37, %v5808_v19  ;;  %v6016_v47 = vmul.f32 %v2673_v37, %v5827_v34  ;;  %v6019_v49 = vmul.f32 %v2673_v37, %v5796_v11  ;;  %v6022_v50 = vmul.f32 %v2673_v37, %v5817_v24 }
 0xfd5   : > { %v5159_v14 = vpack.i.bf16 %v6004_v42, %v6013_v46  ;;  %v5169_v19 = vpack.i.bf16 %v6007_v44, %v6016_v47  ;;  %v5154_v29 = vpack.i.bf16 %v6010_v45, %v6019_v49  ;;  %v5164_v11 = vpack.i.bf16 %v6025_v17, %v6022_v50 }
0x1045   : > { %v2590_v24 = vpop.permute.xlu1 %2589 }
0x1046   : > { %5230 = vrcp.f32 %v2590_v24  ;;  %v2585_v34 = vpop.permute.xlu0 %2584 }
0x1047   : > { %5232 = vrcp.f32 %v2585_v34 }
0x1050   : > { %v5231_v22 = vpop.eup %5230 }
0x1051   : > { %v5233_v52 = vpop.eup %5232  ;;  %v2595_v54 = vmul.f32 %v5231_v22, %v4582_v39 }
0x1052   : > { %v2593_v55 = vmul.f32 %v5233_v52, %v2573_v58 }
0x1053   : > { %v2687_v56 = vmul.f32 %v2684_v51, %v2595_v54 }
0x1054   : > { %v2686_v57 = vmul.f32 %v2684_v51, %v2593_v55 }
0x1055   : > { %v2689_v62 = vadd.f32 %v4593_v35, %v2687_v56 }
0x1056   : > { %v2688_v63 = vadd.f32 %v2686_v57, %v2673_v37  ;;  %2692 = vrot.lane.b32.xlu1 %v2686_v57, %s6426_s30 }
0x1057   : > { %v2712_v4 = vmul.f32 %v2689_v62, %v2689_v62 }
0x1058   : > { %v2711_v3 = vmul.f32 %v2688_v63, %v2688_v63  ;;  %4613 = vmatprep.mubr.msk.f32.mxu0 %vm884_vm1, %v2688_v63 }
0x1059   : > { %4614 = vmatmul.mubr.msk.f32.vlgmr.msra.gmra.mrb[16].mxu0 %vm884_vm1, %v2689_v62 }
0x105a   : > { %2694 = vrot.lane.b32.xlu1 %v2687_v56, %s6426_s30  ;;  %4602 = vmatprep.mubr.msk.f32.mxu1 %vm884_vm1, %v2711_v3  ;;  %s755_s30 = sand.u32 1, %s5332_s2  }
0x105b   : > { %4603 = vmatmul.mubr.msk.f32.vlgmr.msra.gmra.mrb[20].mxu1 %vm884_vm1, %v2712_v4  ;;  %4966 = vmatpush3.bf16.msra.mxu0 %v4947_v31  ;;  %v5270_v4 = vld [vmem:[%s6420_s9 + $0x8] sm:$0xff] }
0x105c   : > { %4958 = vmatpush3.bf16.msra.mxu1 %v5600_v59  ;;  %4968 = vmatprep.subr.bf16.mxu0 %v4951_v13 }
0x105d   : > { %4960 = vmatprep.subr.bf16.mxu1 %v5618_v5 }
0x105f   : > { %4970 = vmatpush3.bf16.msra.mxu0 %v4951_v13 }
0x1060   : > { %4962 = vmatpush3.bf16.msra.mxu1 %v5618_v5  ;;  %4996 = vmatprep.subr.bf16.mxu0 %v5730_v43  ;;  %v4086_v5 = vld [vmem:[%s6342_s10 + $0x1] ss:$0 sm:$0xff] }
0x10c8   : > { %v2693_v6 = vpop.permute.xlu1 %2692 }
0x10c9   : > { %v2698_v7 = vadd.f32 %v2693_v6, %v2673_v37 }
0x10cb   : > { %2974 = vrot.lane.b32.xlu1 %v2698_v7, %s6427_s3  ;;  %v2885_v8 = vmul.f32 %v2698_v7, %v2698_v7  ;;  %v5271_v7 = vld [vmem:[%s6420_s9 + $0x18] sm:$0xff] }
0x10cc   : > { %v2695_v10 = vpop.permute.xlu1 %2694 }
0x10cd   : > { %v2699_v12 = vadd.f32 %v4593_v35, %v2695_v10 }
0x10cf   : > { %v2886_v9 = vmul.f32 %v2699_v12, %v2699_v12 }
0x10d1   : > { %2891 = vrot.lane.b32.xlu1 %v2886_v9, %s6427_s3 }
0x10d5   : > { %2889 = vrot.lane.b32.xlu1 %v2885_v8, %s6427_s3  ;;  %v5273_v8 = vld [vmem:[%s6420_s9 + $0x38] sm:$0xff] }
0x10d9   : > { %2976 = vrot.lane.b32.xlu1 %v2699_v12, %s6427_s3  ;;  %v5272_v12 = vld [vmem:[%s6420_s9 + $0x28] sm:$0xff]  ;;  %s4021_s3 = sshll.u32 %s755_s30, 4 }
0x10da   : > { %s757_s25 = scalar_lea.vmem [#allocation2], %s4021_s3 }
0x10db   : > { %s3955_s8 = sshll.u32 %s757_s25, 4  ;;  %s6284_s8 = int_to_ptr.vmem [resolvable:$true] %s3955_s8 }
0x112c   : > { %v4615_v59 = vpop.f32.mrb[16].mxu0 }
0x112d   : > { %v2872_v15 = vpop.f32.mrb[17].mxu0  ;;  %v6052_v18 = vmul.f32 2.0, %v4615_v59 }
0x112e   : > { %v4604_v16 = vpop.f32.mrb[20].mxu1  ;;  %v2881_v21 = vmul.f32 2.0, %v2872_v15 }
0x112f   : > { %v6054_v0 = vadd.f32 %v4604_v16, %v4086_v5  ;;  %v2791_v20 = vpop.f32.mrb[21].mxu1  ;;  %v5275_v16 = vld [vmem:[%s6420_s9 + $0x10] sm:$0xff] }
0x1130   : > { %v2792_v23 = vadd.f32 %v4086_v5, %v2791_v20 }
0x1131   : > { %v2884_v25 = vsub.f32 %v6054_v0, %v6052_v18 }
0x1132   : > { %v2883_v26 = vsub.f32 %v2792_v23, %v2881_v21  ;;  %v5276_v21 = vld [vmem:[%s6420_s9 + $0x20] sm:$0xff] }
0x1134   : > { %v3061_v32 = vmul.f32 -0.5, %v2883_v26  ;;  %v5277_v26 = vld [vmem:[%s6420_s9 + $0x30] sm:$0xff] }
0x1136   : > { %v3069_v33 = vmul.f32 %v6061_v27, %v3061_v32 }
0x1138   : > { %v3071_v36 = vmul.f32 1.442695, %v3069_v33 }
0x113a   : > { %5234 = vpow2.f32 %v3071_v36 }
0x113d   : > { %v2975_v1 = vpop.permute.xlu1 %2974 }
0x113e   : > { %4635 = vmatprep.mubr.msk.f32.mxu0 %vm884_vm1, %v2975_v1 }
0x1143   : > { %v2892_v39 = vpop.permute.xlu1 %2891 }
0x1144   : > { %v5235_v58 = vpop.eup %5234 }
0x1145   : > { %v3081_v31 = vmul.f32 %v5235_v58, %v6068_v30  ;;  %v3062_v58 = vmul.f32 -0.5, %v2884_v25 }
0x1147   : > { %v2890_v60 = vpop.permute.xlu1 %2889 }
0x1148   : > { %4624 = vmatprep.mubr.msk.f32.mxu1 %vm884_vm1, %v2890_v60  ;;  %v3070_v60 = vmul.f32 %v6061_v27, %v3062_v58  ;;  %v4122_v58 = vld [vmem:[%s6348_s16 + $0x28] sm:$0xff] }
0x1149   : > { %4625 = vmatmul.mubr.msk.f32.vlgmr.msra.gmra.mrb[22].mxu1 %vm884_vm1, %v2892_v39 }
0x114a   : > { %4654 = vmatprep.mubr.msk.f32.mxu1 %vm884_vm1, %v3081_v31  ;;  %v3073_v31 = vmul.f32 1.442695, %v3070_v60 }
0x114b   : > { %v2977_v35 = vpop.permute.xlu1 %2976 }
0x114c   : > { %4636 = vmatmul.mubr.msk.f32.vlgmr.msra.gmra.mrb[18].mxu0 %vm884_vm1, %v2977_v35 }
0x114d   : > { %4998 = vmatpush3.bf16.msra.mxu0 %v5730_v43 }
0x114e   : > { %5000 = vmatprep.subr.bf16.mxu0 %v5743_v48 }
0x1151   : > { %5002 = vmatpush3.bf16.msra.mxu0 %v5743_v48 }
0x1152   : > { %5004 = vmatprep.subr.bf16.mxu0 %v5760_v53 }
0x1155   : > { %5006 = vmatpush3.bf16.msra.mxu0 %v5760_v53 }
0x1156   : > { %5008 = vmatprep.subr.bf16.mxu0 %v5778_v61 }
0x1159   : > { %5010 = vmatpush3.bf16.msra.mxu0 %v5778_v61 }
0x121c   : > { %v4626_v37 = vpop.f32.mrb[22].mxu1 }
0x121d   : > { %v2963_v40 = vpop.f32.mrb[23].mxu1  ;;  %v2969_v13 = vadd.f32 %v4626_v37, %v4086_v5 }
0x121e   : > { %v2964_v22 = vadd.f32 %v4086_v5, %v2963_v40  ;;  %v5274_v5 = vld [vmem:[%s6420_s9] sm:$0xff] }
0x121f   : > { %v4637_v41 = vpop.f32.mrb[18].mxu0 }
0x1220   : > { %v3058_v24 = vmul.f32 2.0, %v4637_v41  ;;  %v3048_v34 = vpop.f32.mrb[19].mxu0 }
0x1221   : > { %v3057_v43 = vmul.f32 2.0, %v3048_v34 }
0x1222   : > { %v3060_v51 = vsub.f32 %v2969_v13, %v3058_v24 }
0x1223   : > { %v3059_v52 = vsub.f32 %v2964_v22, %v3057_v43 }
0x1224   : > { %v3084_v54 = vmul.f32 -0.5, %v3060_v51 }
0x1225   : > { %v3083_v48 = vmul.f32 -0.5, %v3059_v52 }
0x1226   : > { %v3086_v55 = vmul.f32 %v6061_v27, %v3084_v54 }
0x1227   : > { %v3085_v53 = vmul.f32 %v6061_v27, %v3083_v48  ;;  %v4111_v48 = vld [vmem:[%s6425_s7 + $0x20] sm:$0xff] }
0x1228   : > { %v3089_v56 = vmul.f32 1.442695, %v3086_v55  ;;  %v4112_v55 = vld [vmem:[%s6425_s7 + $0x28] sm:$0xff] }
0x1229   : > { %v3087_v57 = vmul.f32 1.442695, %v3085_v53  ;;  %v4113_v53 = vld [vmem:[%s6425_s7 + $0x30] sm:$0xff] }
0x122a   : > { %5236 = vpow2.f32 %v3089_v56  ;;  %v5027_v56 = vpack.c.bf16 %v4112_v55, %v4111_v48  ;;  %v4137_v48 = vld [vmem:[%s6350_s18 + $0xc0] sm:$0xff]  ;;  %v4138_v55 = vld [vmem:[%s6350_s18 + $0xc8] sm:$0xff] }
0x122b   : > { %5238 = vpow2.f32 %v3087_v57  ;;  %v4114_v57 = vld [vmem:[%s6425_s7 + $0x38] sm:$0xff]  ;;  %s5278_s7 = scalar_lea.vmem %s6284_s8, 256 }
0x122c   : > { %5240 = vpow2.f32 %v3073_v31  ;;  %v4123_v31 = vld [vmem:[%s6348_s16 + $0x30] sm:$0xff]  ;;  %p5279_p11 = scmp.ne.s32.totalorder %s6284_s8, %s5278_s7 }
0x122e   : > { %p5280_p12 = pnand %p5279_p11, %p5517_p5 }
0x1230   : > { %p5281_p13 = pneg %p5280_p12 }
0x1234   : > { %v5237_v61 = vpop.eup %5236 }
0x1235   : > { %v5239_v62 = vpop.eup %5238  ;;  %v3092_v63 = vmul.f32 %v5237_v61, %v6068_v30  ;;  %v5031_v61 = vpack.c.bf16 %v4114_v57, %v4113_v53  ;;  %v5059_v53 = vpack.c.bf16 %v4138_v55, %v4137_v48  ;;  %v4140_v57 = vld [vmem:[%s6350_s18 + $0xd8] sm:$0xff] }
0x1236   : > { %v3091_v3 = vmul.f32 %v5239_v62, %v6068_v30  ;;  %v5241_v18 = vpop.eup %5240 }
0x1237   : > { %v3094_v6 = vmul.f32 %v5270_v4, %v3092_v63  ;;  %v3096_v10 = vmul.f32 %v5271_v7, %v3092_v63  ;;  %v3098_v9 = vmul.f32 %v5272_v12, %v3092_v63  ;;  %v3100_v59 = vmul.f32 %v5273_v8, %v3092_v63 }
0x1238   : > { %v3093_v15 = vmul.f32 %v5274_v5, %v3091_v3  ;;  %v3095_v20 = vmul.f32 %v5275_v16, %v3091_v3  ;;  %v3097_v23 = vmul.f32 %v5276_v21, %v3091_v3  ;;  %v3099_v32 = vmul.f32 %v5277_v26, %v3091_v3 }
0x1239   : > { %v3082_v0 = vmul.f32 %v5241_v18, %v6068_v30  ;;  %v4124_v18 = vld [vmem:[%s6348_s16 + $0x38] sm:$0xff] }
0x123a   : > { %v4971_v33 = vpack.c.bf16 %v3094_v6, %v3093_v15  ;;  %v4977_v36 = vpack.c.bf16 %v3096_v10, %v3095_v20  ;;  %v4983_v1 = vpack.c.bf16 %v3098_v9, %v3097_v23  ;;  %v4989_v39 = vpack.c.bf16 %v3100_v59, %v3099_v32 }
0x123c   : > { %4973 = vmatprep.subr.msk.bf16.mxu1 %vm5696_vm6, %v4971_v33 }
0x123d   : > { %4976 = vmatpush3.bf16.xpose.msk.msra.mxu1 %vm5696_vm6, %v4971_v33 }
0x123e   : > { %4979 = vmatprep.subr.msk.bf16.mxu1 %vm5696_vm6, %v4977_v36 }
0x1245   : > { %4982 = vmatpush3.bf16.xpose.msk.msra.mxu1 %vm5696_vm6, %v4977_v36 }
0x1246   : > { %4985 = vmatprep.subr.msk.bf16.mxu1 %vm5696_vm6, %v4983_v1 }
0x124d   : > { %4988 = vmatpush3.bf16.xpose.msk.msra.mxu1 %vm5696_vm6, %v4983_v1 }
0x124e   : > { %4991 = vmatprep.subr.msk.bf16.mxu1 %vm5696_vm6, %v4989_v39 }
0x1255   : > { %4994 = vmatpush3.bf16.xpose.msk.msra.mxu1 %vm5696_vm6, %v4989_v39 }
0x1256   : > { %5028 = vmatprep.subr.bf16.mxu1 %v5027_v56 }
0x125c   : > { %4655 = vmatmul.mubr.msk.f32.vlgmr.msra.gmra.mrb[24].mxu1 %vm884_vm1, %v3082_v0  ;;  %v5039_v0 = vpack.c.bf16 %v4124_v18, %v4123_v31 }
0x125d   : > { %5030 = vmatpush3.bf16.msra.mxu1 %v5027_v56  ;;  %v4139_v56 = vld [vmem:[%s6350_s18 + $0xd0] sm:$0xff] }
0x125e   : > { %5032 = vmatprep.subr.bf16.mxu1 %v5031_v61 }
0x1261   : > { %5034 = vmatpush3.bf16.msra.mxu1 %v5031_v61  ;;  %v5063_v61 = vpack.c.bf16 %v4140_v57, %v4139_v56 }
0x132f   : > { %v4656_v25 = vpop.f32.mrb[24].mxu1 }
0x1330   : > { %v3197_v27 = vpop.f32.mrb[25].mxu1  ;;  %v3209_v35 = vsel %vm1692_vm7, %v4656_v25, -inf }
0x1331   : > { %3210 = vmax.xlane.f32.xlu1 %v3209_v35  ;;  %v3206_v37 = vsel %vm1692_vm7, %v3197_v27, -inf  ;;  %v4131_v35 = vld [vmem:[%s6350_s18 + $0x90] sm:$0xff] }
0x1332   : > { %3207 = vmax.xlane.f32.xlu0 %v3206_v37 }
0x1342   : > { %5160 = vrot.lane.b32.xlu1 %v5159_v14, %s6428_s4 }
0x1346   : > { %5170 = vrot.lane.b32.xlu1 %v5169_v19, %s6428_s4 }
0x1348   : > { %5155 = vrot.lane.b32.xlu0 %v5154_v29, %s6428_s4 }
0x134c   : > { %5165 = vrot.lane.b32.xlu0 %v5164_v11, %s6428_s4  ;;  %s4161_s4 = sshll.u32 %s6429_s28, 8  ;;  %s5346_s28 = smov [#allocation2]  }
0x134d   : > { %s6289_s29 = scalar_lea.hbm %s6432_s1, %s4161_s4  ;;  %s5282_s3 = sshll.u32 %s5346_s28, 4  ;;  %s5283_s3 = int_to_ptr.vmem [resolvable:$false] %s5282_s3 }
0x134e   : > { %s5284_s0 = scalar_lea.vmem %s5283_s3, 512  ;;  %p5285_p0 = scmp.lt.s32.totalorder %s6284_s8, %s5283_s3 }
0x134f   : > { %p5286_p1 = scmp.lt.s32.totalorder %s5284_s0, %s5278_s7 }
0x1351   : > { %p5287_p2 = por %p5286_p1, %p5285_p0 }
0x1353   : > { %p5288_p3 = pnand %p5287_p2, %p5281_p13 }
0x13be   : > { %v3211_v28 = vpop.xlane.xlu1 %3210 }
0x13bf   : > { %v3213_v30 = vsub.f32 %v4656_v25, %v3211_v28  ;;  %v3208_v40 = vpop.xlane.xlu0 %3207  ;;  %v4129_v25 = vld [vmem:[%s6350_s18 + $0x80] sm:$0xff]  ;;  %v4132_v28 = vld [vmem:[%s6350_s18 + $0x98] sm:$0xff] }
0x13c0   : > { %v3212_v42 = vsub.f32 %v3197_v27, %v3208_v40  ;;  %v4130_v27 = vld [vmem:[%s6350_s18 + $0x88] sm:$0xff]  ;;  %v4133_v40 = vld [vmem:[%s6350_s18 + $0xa0] sm:$0xff] }
0x13c1   : > { %v3216_v46 = vmul.f32 1.442695, %v3213_v30  ;;  %v5043_v37 = vpack.c.bf16 %v4130_v27, %v4129_v25  ;;  %v5047_v30 = vpack.c.bf16 %v4132_v28, %v4131_v35 }
0x13c2   : > { %v3214_v14 = vmul.f32 1.442695, %v3212_v42  ;;  %v5161_v45 = vpop.permute.xlu1 %5160  ;;  %v4134_v42 = vld [vmem:[%s6350_s18 + $0xa8] sm:$0xff] }
0x13c3   : > { %v5156_v41 = vpop.permute.xlu0 %5155  ;;  %v5163_v49 = vunpack.i.h.bf16 %v5161_v45  ;;  %v5162_v29 = vunpack.i.l.bf16 %v5161_v45  ;;  %5044 = vmatprep.subr.bf16.mxu1 %v5043_v37 }
0x13c4   : > { %5242 = vpow2.f32 %v3214_v14  ;;  %v5158_v44 = vunpack.i.h.bf16 %v5156_v41  ;;  %v5157_v47 = vunpack.i.l.bf16 %v5156_v41 }
0x13c5   : > { %5244 = vpow2.f32 %v3216_v46  ;;  %v5015_v17 = vpack.c.bf16 %v5163_v49, %v5162_v29  ;;  %v5051_v46 = vpack.c.bf16 %v4134_v42, %v4133_v40  ;;  %v4119_v29 = vld [vmem:[%s6346_s14 + $0x1] ss:$0 sm:$0xff] }
0x13c6   : > { %v5011_v19 = vpack.c.bf16 %v5158_v44, %v5157_v47  ;;  %v5171_v22 = vpop.permute.xlu1 %5170 }
0x13c7   : > { %v5166_v13 = vpop.permute.xlu0 %5165  ;;  %v5173_v43 = vunpack.i.h.bf16 %v5171_v22  ;;  %v5172_v51 = vunpack.i.l.bf16 %v5171_v22 }
0x13c8   : > { %5012 = vmatprep.subr.bf16.mxu0 %v5011_v19  ;;  %v5168_v11 = vunpack.i.h.bf16 %v5166_v13  ;;  %v5167_v34 = vunpack.i.l.bf16 %v5166_v13 }
0x13c9   : > { %v5023_v54 = vpack.c.bf16 %v5173_v43, %v5172_v51  ;;  %v4135_v51 = vld [vmem:[%s6350_s18 + $0xb0] sm:$0xff] }
0x13ca   : > { %v5019_v52 = vpack.c.bf16 %v5168_v11, %v5167_v34 }
0x13ce   : > { %v5243_v24 = vpop.eup %5242 }
0x13cf   : > { %v5245_v50 = vpop.eup %5244  ;;  %4673 = vmatprep.mubr.msk.f32.mxu0 %vm1692_vm7, %v5243_v24 }
0x13d0   : > { %4674 = vmatmul.mubr.msk.f32.vlgmr.msra.gmra.mrb[20].mxu0 %vm1692_vm7, %v5245_v50 }
0x13d1   : > { %5014 = vmatpush3.bf16.msra.mxu0 %v5011_v19 }
0x13d2   : > { %5016 = vmatprep.subr.bf16.mxu0 %v5015_v17 }
0x13d5   : > { %5018 = vmatpush3.bf16.msra.mxu0 %v5015_v17 }
0x13d6   : > { %5020 = vmatprep.subr.bf16.mxu0 %v5019_v52 }
0x13d9   : > { %5022 = vmatpush3.bf16.msra.mxu0 %v5019_v52  ;;  %v4136_v52 = vld [vmem:[%s6350_s18 + $0xb8] sm:$0xff] }
0x13da   : > { %5024 = vmatprep.subr.bf16.mxu0 %v5023_v54 }
0x13dd   : > { %5026 = vmatpush3.bf16.msra.mxu0 %v5023_v54  ;;  %v5055_v54 = vpack.c.bf16 %v4136_v52, %v4135_v51 }
0x14a3   : > { %v4675_v62 = vpop.f32.mrb[20].mxu0 }
0x14a4   : > { %5246 = vrcp.f32 %v4675_v62  ;;  %v3290_v63 = vpop.f32.mrb[21].mxu0  ;;  %v4141_v62 = vld [vmem:[%s6350_s18 + $0xe0] sm:$0xff] }
0x14a5   : > { %5248 = vrcp.f32 %v3290_v63  ;;  %v4142_v63 = vld [vmem:[%s6350_s18 + $0xe8] sm:$0xff] }
0x14ae   : > { %v5247_v3 = vpop.eup %5246 }
0x14af   : > { %v5249_v4 = vpop.eup %5248  ;;  %v3302_v7 = vmul.f32 %v5247_v3, %v5245_v50  ;;  %v5067_v3 = vpack.c.bf16 %v4142_v63, %v4141_v62 }
0x14b0   : > { %v3300_v6 = vmul.f32 %v5249_v4, %v5243_v24  ;;  %v4120_v24 = vld [vmem:[%s6347_s15 + $0x1] ss:$0 sm:$0xff]  ;;  %v4143_v4 = vld [vmem:[%s6350_s18 + $0xf0] sm:$0xff] }
0x14b2   : > { %4692 = vmatprep.mubr.msk.f32.mxu0 %vm1692_vm7, %v3300_v6  ;;  %v4144_v6 = vld [vmem:[%s6350_s18 + $0xf8] sm:$0xff] }
0x14b3   : > { %4693 = vmatmul.mubr.msk.f32.vlgmr.msra.gmra.mrb[22].mxu0 %vm1692_vm7, %v3302_v7  ;;  %v5071_v7 = vpack.c.bf16 %v4144_v6, %v4143_v4  ;;  %v3854_v6 = vld [vmem:[%s6356_s24] sm:$0xff] }
0x1586   : > { %v4694_v10 = vpop.f32.mrb[22].mxu0 }
0x1587   : > { %v3415_v12 = vpop.f32.mrb[23].mxu0 }
0x1588   : > { %4703 = vmatprep.mubr.msk.f32.mxu1 %vm884_vm1, %v3415_v12 }
0x1589   : > { %4704 = vmatmul.mubr.msk.f32.vlgmr.msra.gmra.mrb[26].mxu1 %vm884_vm1, %v4694_v10  ;;  %v4126_v10 = vld [vmem:[%s6349_s17 + $0x1] ss:$0 sm:$0xff] }
0x158a   : > { %5046 = vmatpush3.bf16.msra.mxu1 %v5043_v37 }
0x158b   : > { %5048 = vmatprep.subr.bf16.mxu1 %v5047_v30 }
0x158e   : > { %5050 = vmatpush3.bf16.msra.mxu1 %v5047_v30 }
0x158f   : > { %5052 = vmatprep.subr.bf16.mxu1 %v5051_v46 }
0x1592   : > { %5054 = vmatpush3.bf16.msra.mxu1 %v5051_v46 }
0x1593   : > { %5056 = vmatprep.subr.bf16.mxu1 %v5055_v54 }
0x1596   : > { %5058 = vmatpush3.bf16.msra.mxu1 %v5055_v54 }
0x1597   : > { %5060 = vmatprep.subr.bf16.mxu1 %v5059_v53 }
0x159a   : > { %5062 = vmatpush3.bf16.msra.mxu1 %v5059_v53 }
0x159b   : > { %5064 = vmatprep.subr.bf16.mxu1 %v5063_v61 }
0x159e   : > { %5066 = vmatpush3.bf16.msra.mxu1 %v5063_v61 }
0x159f   : > { %5068 = vmatprep.subr.bf16.mxu1 %v5067_v3 }
0x15a2   : > { %5070 = vmatpush3.bf16.msra.mxu1 %v5067_v3 }
0x15a3   : > { %5072 = vmatprep.subr.bf16.mxu1 %v5071_v7 }
0x15a6   : > { %5074 = vmatpush3.bf16.msra.mxu1 %v5071_v7  ;;  %v3855_v7 = vld [vmem:[%s6356_s24 + $0x8] sm:$0xff] }
0x165c   : > { %v4705_v9 = vpop.f32.mrb[26].mxu1 }
0x165d   : > { %v3511_v8 = vadd.f32 %v4705_v9, %v5942_v38  ;;  %v3501_v59 = vpop.f32.mrb[27].mxu1 }
0x165e   : > { %v3510_v5 = vadd.f32 %v3501_v59, %v5944_v2  ;;  %v4121_v2 = vld [vmem:[%s6348_s16 + $0x20] sm:$0xff] }
0x165f   : > { %v3519_v15 = vsel %vm884_vm1, %v3511_v8, 0.0  ;;  %v5035_v60 = vpack.c.bf16 %v4122_v58, %v4121_v2 }
0x1660   : > { %3520 = vadd.xlane.f32.xlu1 %v3519_v15  ;;  %v3516_v16 = vsel %vm884_vm1, %v3510_v5, 0.0 }
0x1661   : > { %3517 = vadd.xlane.f32.xlu0 %v3516_v16  ;;  %5036 = vmatprep.subr.bf16.mxu0 %v5035_v60 }
0x1662   : > { %5038 = vmatpush3.bf16.msra.mxu0 %v5035_v60 }
0x1663   : > { %5040 = vmatprep.subr.bf16.mxu0 %v5039_v0 }
0x1666   : > { %5042 = vmatpush3.bf16.msra.mxu0 %v5039_v0 }
0x16ed   : > { %v3521_v20 = vpop.xlane.xlu1 %3520 }
0x16ee   : > { %v3523_v21 = vmul.f32 0.03125, %v3521_v20  ;;  %v3518_v23 = vpop.xlane.xlu0 %3517 }
0x16ef   : > { %v3522_v26 = vmul.f32 0.03125, %v3518_v23 }
0x16f0   : > { %v3525_v32 = vsub.f32 %v3511_v8, %v3523_v21 }
0x16f1   : > { %v3524_v33 = vsub.f32 %v3510_v5, %v3522_v26 }
0x16f2   : > { %v3527_v39 = vmul.f32 %v3525_v32, %v3525_v32 }
0x16f3   : > { %v3526_v36 = vmul.f32 %v3524_v33, %v3524_v33 }
0x16f4   : > { %v3531_v38 = vsel %vm884_vm1, %v3527_v39, 0.0 }
0x16f5   : > { %v3528_v1 = vsel %vm884_vm1, %v3526_v36, 0.0 }
0x16f6   : > { %3529 = vadd.xlane.f32.xlu0 %v3528_v1  ;;  %v4146_v1 = vld [vmem:[%s6351_s19 + $0x1] ss:$0 sm:$0xff] }
0x16fa   : > { %3532 = vadd.xlane.f32.xlu0 %v3531_v38 }
0x1783   : > { %v3530_v14 = vpop.xlane.xlu0 %3529 }
0x1784   : > { %v3534_v41 = vmul.f32 0.03125, %v3530_v14 }
0x1786   : > { %v3536_v44 = vadd.f32 1e-05, %v3534_v41 }
0x1787   : > { %v3533_v47 = vpop.xlane.xlu0 %3532 }
0x1788   : > { %5250 = vrsqrt.f32 %v3536_v44  ;;  %v3535_v19 = vmul.f32 0.03125, %v3533_v47 }
0x178a   : > { %v3537_v45 = vadd.f32 1e-05, %v3535_v19 }
0x178c   : > { %5252 = vrsqrt.f32 %v3537_v45 }
0x1792   : > { %v5251_v49 = vpop.eup %5250 }
0x1793   : > { %v3540_v13 = vmul.f32 %v5251_v49, %v3524_v33 }
0x1795   : > { %v3548_v50 = vmul.f32 %v4119_v29, %v3540_v13  ;;  %v4149_v13 = vld [vmem:[%s6352_s20 + $0x1] ss:$0 sm:$0xff] }
0x1796   : > { %v5253_v17 = vpop.eup %5252 }
0x1797   : > { %v3541_v11 = vmul.f32 %v5253_v17, %v3525_v32  ;;  %v3556_v34 = vadd.f32 %v4120_v24, %v3548_v50  ;;  %v4150_v17 = vld [vmem:[%s6353_s21 + $0x1] ss:$0 sm:$0xff] }
0x1799   : > { %v3549_v22 = vmul.f32 %v4119_v29, %v3541_v11  ;;  %4714 = vmatprep.mubr.msk.f32.mxu0 %vm884_vm1, %v3556_v34 }
0x179b   : > { %v3557_v43 = vadd.f32 %v4120_v24, %v3549_v22 }
0x179d   : > { %4715 = vmatmul.mubr.msk.f32.vlgmr.msra.gmra.mrb[24].mxu0 %vm884_vm1, %v3557_v43 }
0x1870   : > { %v4716_v12 = vpop.f32.mrb[24].mxu0 }
0x1871   : > { %v3649_v9 = vadd.f32 %v4716_v12, %v4126_v10  ;;  %v3643_v8 = vpop.f32.mrb[25].mxu0  ;;  %v3856_v12 = vld [vmem:[%s6356_s24 + $0x10] sm:$0xff] }
0x1872   : > { %v3644_v59 = vadd.f32 %v4126_v10, %v3643_v8  ;;  %v5075_v10 = vpack.c.bf16 %v3855_v7, %v3854_v6 }
0x1873   : > { %v3655_v5 = vmul.f32 0.70710677, %v3649_v9  ;;  %v3653_v32 = vmul.f32 0.5, %v3649_v9  ;;  %v3857_v9 = vld [vmem:[%s6356_s24 + $0x18] sm:$0xff] }
0x1874   : > { %v3654_v15 = vmul.f32 0.70710677, %v3644_v59  ;;  %v3652_v23 = vmul.f32 0.5, %v3644_v59  ;;  %v5079_v8 = vpack.c.bf16 %v3857_v9, %v3856_v12  ;;  %5076 = vmatprep.subr.bf16.mxu0 %v5075_v10 }
0x1875   : > { %5254 = verf.f32 %v3655_v5  ;;  %5078 = vmatpush3.bf16.msra.mxu0 %v5075_v10 }
0x1876   : > { %5256 = verf.f32 %v3654_v15  ;;  %5080 = vmatprep.subr.bf16.mxu0 %v5079_v8 }
0x1879   : > { %5082 = vmatpush3.bf16.msra.mxu0 %v5079_v8 }
0x187f   : > { %v5255_v16 = vpop.eup %5254 }
0x1880   : > { %v5257_v20 = vpop.eup %5256  ;;  %v3659_v21 = vadd.f32 1.0, %v5255_v16 }
0x1881   : > { %v3658_v26 = vadd.f32 1.0, %v5257_v20 }
0x1882   : > { %v3661_v36 = vmul.f32 %v3659_v21, %v3653_v32 }
0x1883   : > { %v3660_v33 = vmul.f32 %v3658_v26, %v3652_v23  ;;  %v4151_v26 = vld [vmem:[%s6354_s22] ss:$0 sm:$0xff] }
0x1885   : > { %4749 = vmatprep.mubr.f32.mxu1 %v3660_v33 }
0x1886   : > { %4750 = vmatmul.mubr.f32.vlgmr.msra.gmra.mrb[28].mxu1 %v3661_v36 }
0x1959   : > { %v4751_v39 = vpop.f32.mrb[28].mxu1 }
0x195a   : > { %v3759_v38 = vadd.f32 %v4751_v39, %v4146_v1  ;;  %v3753_v2 = vpop.f32.mrb[29].mxu1 }
0x195b   : > { %v3754_v58 = vadd.f32 %v4146_v1, %v3753_v2  ;;  %v4152_v1 = vld [vmem:[%s6430_s6] ss:$0 sm:$0xff]  ;;  %s6291_s6 = scalar_lea.sflag [#allocation3], %s755_s30 }
0x195c   : > { %v3763_v60 = vadd.f32 %v3759_v38, %v3557_v43 }
0x195d   : > { %v3762_v31 = vadd.f32 %v3754_v58, %v3556_v34 }
0x195e   : > { %v3771_v18 = vsel %vm884_vm1, %v3763_v60, 0.0 }
0x195f   : > { %3772 = vadd.xlane.f32.xlu0 %v3771_v18  ;;  %v3768_v0 = vsel %vm884_vm1, %v3762_v31, 0.0 }
0x1960   : > { %3769 = vadd.xlane.f32.xlu1 %v3768_v0 }
0x19ec   : > { %v3773_v25 = vpop.xlane.xlu0 %3772 }
0x19ed   : > { %v3775_v27 = vmul.f32 0.03125, %v3773_v25  ;;  %v3770_v35 = vpop.xlane.xlu1 %3769 }
0x19ee   : > { %v3774_v37 = vmul.f32 0.03125, %v3770_v35 }
0x19ef   : > { %v3777_v28 = vsub.f32 %v3763_v60, %v3775_v27 }
0x19f0   : > { %v3776_v30 = vsub.f32 %v3762_v31, %v3774_v37 }
0x19f1   : > { %v3779_v40 = vmul.f32 %v3777_v28, %v3777_v28 }
0x19f2   : > { %v3778_v42 = vmul.f32 %v3776_v30, %v3776_v30 }
0x19f3   : > { %v3783_v46 = vsel %vm884_vm1, %v3779_v40, 0.0 }
0x19f4   : > { %3784 = vadd.xlane.f32.xlu0 %v3783_v46  ;;  %v3780_v14 = vsel %vm884_vm1, %v3778_v42, 0.0 }
0x19f5   : > { %3781 = vadd.xlane.f32.xlu1 %v3780_v14 }
0x1a81   : > { %v3785_v41 = vpop.xlane.xlu0 %3784 }
0x1a82   : > { %v3787_v44 = vmul.f32 0.03125, %v3785_v41  ;;  %v3782_v47 = vpop.xlane.xlu1 %3781 }
0x1a83   : > { %v3786_v19 = vmul.f32 0.03125, %v3782_v47 }
0x1a84   : > { %v3789_v45 = vadd.f32 1e-05, %v3787_v44 }
0x1a85   : > { %v3788_v49 = vadd.f32 1e-05, %v3786_v19 }
0x1a86   : > { %5258 = vrsqrt.f32 %v3789_v45 }
0x1a87   : > { %5260 = vrsqrt.f32 %v3788_v49 }
0x1a90   : > { %v5259_v29 = vpop.eup %5258 }
0x1a91   : > { %v5261_v24 = vpop.eup %5260  ;;  %v3793_v50 = vmul.f32 %v5259_v29, %v3777_v28 }
0x1a92   : > { %v3792_v11 = vmul.f32 %v5261_v24, %v3776_v30 }
0x1a93   : > { %v3801_v34 = vmul.f32 %v4149_v13, %v3793_v50 }
0x1a94   : > { %v3800_v22 = vmul.f32 %v4149_v13, %v3792_v11 }
0x1a95   : > { %v3809_v43 = vadd.f32 %v4150_v17, %v3801_v34 }
0x1a96   : > { %v3808_v51 = vadd.f32 %v4150_v17, %v3800_v22 }
0x1a97   : > { %v3815_v52 = vsel %vm884_vm1, %v3809_v43, 0.0 }
0x1a98   : > { %3816 = vadd.xlane.f32.xlu0 %v3815_v52  ;;  %v3812_v54 = vsel %vm884_vm1, %v3808_v51, 0.0 }
0x1a99   : > { %3813 = vadd.xlane.f32.xlu1 %v3812_v54 }
0x1b25   : > { %v3817_v48 = vpop.xlane.xlu0 %3816 }
0x1b26   : > { %v3819_v55 = vmul.f32 0.03125, %v3817_v48  ;;  %v3814_v53 = vpop.xlane.xlu1 %3813 }
0x1b27   : > { %v3818_v56 = vmul.f32 0.03125, %v3814_v53 }
0x1b28   : > { %v3821_v57 = vsub.f32 %v3809_v43, %v3819_v55 }
0x1b29   : > { %v3820_v61 = vsub.f32 %v3808_v51, %v3818_v56 }
0x1b2a   : > { %v3823_v62 = vmul.f32 %v3821_v57, %v3821_v57 }
0x1b2b   : > { %v3822_v63 = vmul.f32 %v3820_v61, %v3820_v61 }
0x1b2c   : > { %v3827_v3 = vsel %vm884_vm1, %v3823_v62, 0.0 }
0x1b2d   : > { %3828 = vadd.xlane.f32.xlu0 %v3827_v3  ;;  %v3824_v4 = vsel %vm884_vm1, %v3822_v63, 0.0 }
0x1b2e   : > { %3825 = vadd.xlane.f32.xlu1 %v3824_v4 }
0x1bba   : > { %v3829_v59 = vpop.xlane.xlu0 %3828 }
0x1bbb   : > { %v3831_v5 = vmul.f32 0.03125, %v3829_v59  ;;  %v3826_v15 = vpop.xlane.xlu1 %3825 }
0x1bbc   : > { %v3830_v16 = vmul.f32 0.03125, %v3826_v15 }
0x1bbd   : > { %v3833_v20 = vadd.f32 1e-05, %v3831_v5 }
0x1bbe   : > { %v3832_v21 = vadd.f32 1e-05, %v3830_v16 }
0x1bbf   : > { %5262 = vrsqrt.f32 %v3833_v20 }
0x1bc0   : > { %5264 = vrsqrt.f32 %v3832_v21 }
0x1bc9   : > { %v5263_v23 = vpop.eup %5262 }
0x1bca   : > { %v5265_v32 = vpop.eup %5264  ;;  %v3837_v33 = vmul.f32 %v5263_v23, %v3821_v57 }
0x1bcb   : > { %v3836_v36 = vmul.f32 %v5265_v32, %v3820_v61 }
0x1bcc   : > { %v3845_v39 = vmul.f32 %v4151_v26, %v3837_v33 }
0x1bcd   : > { %v3844_v38 = vmul.f32 %v4151_v26, %v3836_v36 }
0x1bce   : > { %v3853_v58 = vadd.f32 %v4152_v1, %v3845_v39 }
0x1bcf   : > { %v3852_v2 = vadd.f32 %v4152_v1, %v3844_v38 }
0x1bd1   : > { %4760 = vmatprep.mubr.msk.f32.mxu0 %vm884_vm1, %v3852_v2 }
0x1bd2   : > { %4761 = vmatmul.mubr.msk.f32.vlgmr.msra.gmra.mrb[26].mxu0 %vm884_vm1, %v3853_v58 }
0x1ca5   : > { %v4762_v60 = vpop.f32.mrb[26].mxu0 }
0x1ca6   : > { %3940 = vst [vmem:[%s757_s25 + $0x8] sm:$0xff] %v4762_v60  ;;  %v3930_v31 = vpop.f32.mrb[27].mxu0 }
0x1ca7   : > { %3939 = vst [vmem:[%s757_s25] sm:$0xff] %v3930_v31 }
0x1ca8   : > { %5291 = shalt.err (!%p5288_p3)
}
0x1ca9   : > { %s5292_s5 = scalar_lea.hbm %s6289_s29, 256  ;;  %s5296_s4 = scalar_lea.hbm %s6432_s1, 512 }
0x1caa   : > { %p5293_p4 = scmp.ne.s32.totalorder %s6289_s29, %s5292_s5  ;;  %p5297_p9 = scmp.lt.u32.totalorder %s6289_s29, %s6432_s1 }
0x1cab   : > { %p5298_p10 = scmp.lt.u32.totalorder %s5296_s4, %s5292_s5  ;;  %p5300_p12 = scmp.lt.u32.totalorder %s5292_s5, %s6289_s29 }
0x1cac   : > { %p5294_p7 = pnand %p5293_p4, %p5517_p5 }
0x1cad   : > { %p5299_p11 = por %p5298_p10, %p5297_p9 }
0x1cae   : > { %p5295_p8 = pneg %p5294_p7 }
0x1caf   : > { %p5301_p13 = por %p5300_p12, %p5299_p11 }
0x1cb1   : > { %p5302_p0 = pnand %p5301_p13, %p5295_p8 }
0x1cb3   : > { %5305 = shalt.err (!%p5302_p0)
}
0x1cb4   : > { %s5347_s7 = smov 128   ;;  %s5348_s0 = smov 8  }
0x1cb5   : > { %5087 = dma.vmem_to_hbm [thread:$0]  (%p5517_p5), %s6284_s8, 256, %s6289_s29, %s6291_s6, %s5347_s7, %s5347_s7, %s5348_s0  }
0x1cb6 PF: > { %s6433_s30 = sld [smem:[#allocation7_spill]]  ;;  %s6434_s25 = sld [smem:[#allocation5_spill]] }
0x1cbc   : > { %p5093_p1 = scmp.ge.s32.totalorder %s6433_s30, 2  ;;  %s3970_s28 = sand.u32 1, %s6434_s25  }
0x1cbd   : > { %s3971_s5 = scalar_lea.sflag [#allocation3], %s3970_s28 }
0x1cbe   : > { %p5090_p2 = pnand %p5093_p1, %p5521_p6 }
0x1cc0   : > { %5323 = dma.done.wait (!%p5090_p2), %s3971_s5, 256  }
0x1cc1   : > { %5325 = vsyncadd (!%p5090_p2), %s3971_s5, 4294967040  ;;  %s6436_s30 = sld [smem:[#allocation9_spill]]  ;;  %s6437_s4 = sld [smem:[#allocation6_spill]] }
0x1cc2   : > { %s6438_s6 = sld [smem:[#allocation10_spill]]  ;;  %s6439_s29 = smov %s5332_s2 }
0x1cc7   : > { %p35_p3 = scmp.ge.s32.totalorder %s6436_s30, 4   ;;  %s6440_s2 = smov %s6437_s4 }
0x1cc9   :  { %37 = sbr.rel (!%p35_p3) target bundleno = 16 (0x10), region = 169 }
0x1cd0   :  { %3976 = vsyncpa [#allocation3], 1 }
0x1cd1   :  { %3978 = vsyncpa [#allocation3 + $0x1], 1 }

</bundles_post_ra>
